<compile_context>
chip_gen: v7x
topology: tpu7x:2x2x1
jax: 0.10.0
libtpu: 0.0.40
codegen_flags: <defaults>
</compile_context>

<pallas_src>
import numpy as np
import jax
import jax.numpy as jnp
from jax.experimental import pallas as pl
from jax.experimental.pallas import tpu as pltpu

STATE_DIM = 5
OBS_DIM = 2
ACTION_DIM = 2
POS_DIM = 3
DT = 0.1
LANE = 128                      # lane width of a vreg
DEFAULT_SUBLANE_TILE = 64       # 64 sublanes * 128 lanes = 8192 batch elems / grid step
FLOATS_PER_ELEM = (STATE_DIM + STATE_DIM * STATE_DIM + OBS_DIM + ACTION_DIM + 2
                   + STATE_DIM + STATE_DIM * STATE_DIM)   # in + out f32 per element = 66

# SMEM scalar packing: [pg0, pg1, dt, k3, k4, p33, p44]
IDX_PG0, IDX_PG1, IDX_DT, IDX_K3, IDX_K4, IDX_P33, IDX_P44 = range(7)


def _ekf_kernel(s_ref, x_ref, P_ref, o_ref, a_ref, pert_ref, b_out_ref, P_out_ref):
    pg0 = s_ref[IDX_PG0]
    pg1 = s_ref[IDX_PG1]
    dt = s_ref[IDX_DT]
    k3 = s_ref[IDX_K3]       # Kalman gain K[3,0] (scalar, shared across batch)
    k4 = s_ref[IDX_K4]       # Kalman gain K[4,1]
    p33 = s_ref[IDX_P33]     # posterior P_t[3,3] = (1-k3)*pro_var (scalar)
    p44 = s_ref[IDX_P44]     # posterior P_t[4,4] = (1-k4)*pro_var

    # Per-component slabs, each (SUB, LANE): batch fills all sublanes and lanes.
    px = x_ref[0, :, :]
    py = x_ref[1, :, :]
    hd = x_ref[2, :, :]
    v = x_ref[3, :, :]
    w = x_ref[4, :, :]

    ch = jnp.cos(hd)          # EUP; reused by dynamics and Jacobian
    sh = jnp.sin(hd)
    vdt = v * dt

    # ---------------- predicted mean + measurement update -----------------------
    # Rows 3,4 of A are identically zero, so P_[0:3, 3:5] == 0 and the Kalman gain
    # is zero for rows 0..2: those rows of b_t equal the predicted mean exactly.
    b_out_ref[0, :, :] = px + vdt * ch
    b_out_ref[1, :, :] = py + vdt * sh
    b_out_ref[2, :, :] = hd + w * dt
    b3 = pg0 * a_ref[0, :, :] + pert_ref[0, :, :]
    b4 = pg1 * a_ref[1, :, :] + pert_ref[1, :, :]
    b_out_ref[3, :, :] = b3 + k3 * (o_ref[0, :, :] - b3)
    b_out_ref[4, :, :] = b4 + k4 * (o_ref[1, :, :] - b4)

    # ---------------- Jacobian entries (only the state-dependent ones) ----------
    a02 = -vdt * sh
    a03 = ch * dt
    a12 = vdt * ch
    a13 = sh * dt

    zero = jnp.zeros_like(px)

    # ---------------- covariance rows 0..2: (A P A^T) rows 0..2 -----------------
    # Row-by-row so the 5 AP slabs retire right after their P_t row is stored.
    def ap_row(i, c):
        if i == 0:
            return P_ref[0, c, :, :] + a02 * P_ref[2, c, :, :] + a03 * P_ref[3, c, :, :]
        if i == 1:
            return P_ref[1, c, :, :] + a12 * P_ref[2, c, :, :] + a13 * P_ref[3, c, :, :]
        return P_ref[2, c, :, :] + dt * P_ref[4, c, :, :]

    for i in range(POS_DIM):
        ap = [ap_row(i, c) for c in range(STATE_DIM)]
        P_out_ref[i, 0, :, :] = ap[0] + a02 * ap[2] + a03 * ap[3]
        P_out_ref[i, 1, :, :] = ap[1] + a12 * ap[2] + a13 * ap[3]
        P_out_ref[i, 2, :, :] = ap[2] + dt * ap[4]
        P_out_ref[i, 3, :, :] = zero      # structurally exact zeros (A rows 3,4 == 0)
        P_out_ref[i, 4, :, :] = zero

    # ---------------- covariance rows 3,4: (1-k) * Q diagonal -------------------
    P_out_ref[3, 0, :, :] = zero
    P_out_ref[3, 1, :, :] = zero
    P_out_ref[3, 2, :, :] = zero
    P_out_ref[3, 3, :, :] = zero + p33
    P_out_ref[3, 4, :, :] = zero
    P_out_ref[4, 0, :, :] = zero
    P_out_ref[4, 1, :, :] = zero
    P_out_ref[4, 2, :, :] = zero
    P_out_ref[4, 3, :, :] = zero
    P_out_ref[4, 4, :, :] = zero + p44


def _pad_lanes_to(arr, bp):
    pad = bp - arr.shape[-1]
    if pad == 0:
        return arr
    return jnp.pad(arr, [(0, 0)] * (arr.ndim - 1) + [(0, pad)])


def belief_step_pallas_batched(x, P, o_t, a, perturbation_vt, perturbation_wt,
                               pro_gains, pro_noise_var, obs_noise_var, dt=DT,
                               sublane_tile=DEFAULT_SUBLANE_TILE,
                               vmem_limit_bytes=None):
    """Batched EKF belief update; batch is the trailing axis.

    x: (5, B), P: (5, 5, B), o_t: (2, B), a: (2, B),
    perturbation_vt / perturbation_wt: scalars or (B,).
    Returns (b_t: (5, B), P_t: (5, 5, B)).
    """
    f32 = jnp.float32
    x = jnp.asarray(x, f32)
    P = jnp.asarray(P, f32)
    o_t = jnp.asarray(o_t, f32)
    a = jnp.asarray(a, f32)
    B = x.shape[-1]

    pert = jnp.stack(
        [jnp.broadcast_to(jnp.asarray(perturbation_vt, f32), (B,)),
         jnp.broadcast_to(jnp.asarray(perturbation_wt, f32), (B,))], axis=0)

    pg = jnp.reshape(jnp.asarray(pro_gains, f32), (2,))
    pro_var = jnp.reshape(jnp.asarray(pro_noise_var, f32), ())
    obs_var = jnp.broadcast_to(
        jnp.reshape(jnp.asarray(obs_noise_var, f32), (-1,)), (2,))
    dt_f = jnp.reshape(jnp.asarray(dt, f32), (1,))

    # Rows 3,4 of A are zero => S = diag(pro_var+obs_var) and the gain is a pure
    # function of the shared scalars; fold it here (tiny scalar ops outside kernel).
    s_diag = pro_var + obs_var                     # (2,)
    k_gain = pro_var / s_diag                      # K[3,0], K[4,1]
    p_diag = (1.0 - k_gain) * pro_var              # posterior P_t[3,3], P_t[4,4]
    scalars = jnp.concatenate([pg, dt_f, k_gain, p_diag])   # (7,) -> SMEM

    # TODO(synk): for B not a multiple of 128 we fall back to a wrapper-side pad;
    # an in-kernel lane mask would avoid this extra HBM pass (the aligned path is copy-free).
    bp = ((B + LANE - 1) // LANE) * LANE
    xr = _pad_lanes_to(x, bp).reshape(STATE_DIM, bp // LANE, LANE)
    Pr = _pad_lanes_to(P, bp).reshape(STATE_DIM, STATE_DIM, bp // LANE, LANE)
    orr = _pad_lanes_to(o_t, bp).reshape(OBS_DIM, bp // LANE, LANE)
    ar = _pad_lanes_to(a, bp).reshape(ACTION_DIM, bp // LANE, LANE)
    pr = _pad_lanes_to(pert, bp).reshape(2, bp // LANE, LANE)

    nb = bp // LANE
    if nb <= sublane_tile or nb <= 8:
        sub = nb                                  # single full-extent block
    else:
        sub = max(8, (min(sublane_tile, nb) // 8) * 8)   # multiple of 8
    n_tiles = pl.cdiv(nb, sub)                    # last block may be partial (masked)

    grid_spec = pltpu.PrefetchScalarGridSpec(
        num_scalar_prefetch=1,
        grid=(n_tiles,),
        in_specs=[
            pl.BlockSpec((STATE_DIM, sub, LANE), lambda i, s: (0, i, 0)),
            pl.BlockSpec((STATE_DIM, STATE_DIM, sub, LANE), lambda i, s: (0, 0, i, 0)),
            pl.BlockSpec((OBS_DIM, sub, LANE), lambda i, s: (0, i, 0)),
            pl.BlockSpec((ACTION_DIM, sub, LANE), lambda i, s: (0, i, 0)),
            pl.BlockSpec((2, sub, LANE), lambda i, s: (0, i, 0)),
        ],
        out_specs=(
            pl.BlockSpec((STATE_DIM, sub, LANE), lambda i, s: (0, i, 0)),
            pl.BlockSpec((STATE_DIM, STATE_DIM, sub, LANE), lambda i, s: (0, 0, i, 0)),
        ),
    )

    cp_kwargs = dict(dimension_semantics=("parallel",))
    if vmem_limit_bytes is None:
        # double-buffered in+out tiles; only raise the scoped limit when needed
        est = 2 * sub * LANE * FLOATS_PER_ELEM * 4
        if est > 12 * 2**20:
            vmem_limit_bytes = min(2 * est, 48 * 2**20)
    if vmem_limit_bytes is not None:
        cp_kwargs["vmem_limit_bytes"] = int(vmem_limit_bytes)

    b4, P4 = pl.pallas_call(
        _ekf_kernel,
        out_shape=(jax.ShapeDtypeStruct((STATE_DIM, nb, LANE), f32),
                   jax.ShapeDtypeStruct((STATE_DIM, STATE_DIM, nb, LANE), f32)),
        grid_spec=grid_spec,
        compiler_params=pltpu.CompilerParams(**cp_kwargs),
    )(scalars, xr, Pr, orr, ar, pr)

    b_t = b4.reshape(STATE_DIM, bp)[:, :B]
    P_t = P4.reshape(STATE_DIM, STATE_DIM, bp)[:, :, :B]
    return b_t, P_t


def belief_step_pallas(b, o_t, a, perturbation_vt, perturbation_wt,
                       pro_gains, pro_noise_var, obs_noise_var, H=None, dt=DT):
    """Single-instance EKF step matching BeliefStep.forward.

    The module's H (selector of the last two state components) is baked into the
    kernel; if an explicit H is passed it is validated against that structure.
    """
    if H is not None:
        H_exp = np.zeros((OBS_DIM, STATE_DIM), np.float32)
        H_exp[0, -2] = 1.0
        H_exp[1, -1] = 1.0
        if not np.allclose(np.asarray(H, np.float32), H_exp):
            raise ValueError("belief_step_pallas only supports the module's fixed H "
                             "(selector of the last two state components).")
    x_last, P_last = b
    x = jnp.reshape(jnp.asarray(x_last, jnp.float32), (STATE_DIM, 1))
    P = jnp.reshape(jnp.asarray(P_last, jnp.float32), (STATE_DIM, STATE_DIM, 1))
    o = jnp.reshape(jnp.asarray(o_t, jnp.float32), (OBS_DIM, 1))
    av = jnp.reshape(jnp.asarray(a, jnp.float32), (ACTION_DIM, 1))
    b_t, P_t = belief_step_pallas_batched(x, P, o, av, perturbation_vt,
                                          perturbation_wt, pro_gains,
                                          pro_noise_var, obs_noise_var, dt=dt)
    return b_t.reshape(STATE_DIM, 1), P_t[:, :, 0]


def belief_step_ref_batched(x, P, o, a, pvt, pwt, pro_gains, pro_noise_var,
                            obs_noise_var, dt=DT):
    """float64 numpy reference using the module's general matrix formulas."""
    B = x.shape[-1]
    x = np.asarray(x, np.float64).T                       # (B,5)
    P = np.moveaxis(np.asarray(P, np.float64), -1, 0)     # (B,5,5)
    o = np.asarray(o, np.float64).T                       # (B,2)
    a = np.asarray(a, np.float64).T                       # (B,2)
    pvt = np.broadcast_to(np.asarray(pvt, np.float64), (B,))
    pwt = np.broadcast_to(np.asarray(pwt, np.float64), (B,))
    pg = np.asarray(pro_gains, np.float64).reshape(2)
    ovar = np.broadcast_to(np.asarray(obs_noise_var, np.float64).reshape(-1), (2,))

    px, py, hd, v, w = (x[:, i] for i in range(STATE_DIM))
    ch, sh = np.cos(hd), np.sin(hd)
    b_ = np.stack([px + v * ch * dt, py + v * sh * dt, hd + w * dt,
                   pg[0] * a[:, 0] + pvt, pg[1] * a[:, 1] + pwt], axis=1)  # (B,5)
    A = np.zeros((B, STATE_DIM, STATE_DIM))
    A[:, 0, 0] = 1.0
    A[:, 1, 1] = 1.0
    A[:, 2, 2] = 1.0
    A[:, 0, 2] = -v * sh * dt
    A[:, 0, 3] = ch * dt
    A[:, 1, 2] = v * ch * dt
    A[:, 1, 3] = sh * dt
    A[:, 2, 4] = dt
    Q = np.zeros((STATE_DIM, STATE_DIM))
    Q[3, 3] = pro_noise_var
    Q[4, 4] = pro_noise_var
    R = np.diag(ovar)
    H = np.zeros((OBS_DIM, STATE_DIM))
    H[0, -2] = 1.0
    H[1, -1] = 1.0

    P_ = A @ P @ np.transpose(A, (0, 2, 1)) + Q
    y = o - b_ @ H.T
    S = H @ P_ @ H.T + R
    K = P_ @ H.T @ np.linalg.inv(S)
    b_t = b_ + (K @ y[..., None])[..., 0]
    P_t = (np.eye(STATE_DIM) - K @ H) @ P_
    return b_t.T, np.moveaxis(P_t, 0, -1)                 # (5,B), (5,5,B)


if __name__ == "__main__":
    key = jax.random.PRNGKey(0)
    ks = jax.random.split(key, 8)
    # B not a multiple of 128 and not a multiple of the sublane tile: exercises the
    # lane-pad fallback plus a masked partial sublane block and a 2-step grid.
    B = 1100

    pro_gains = jnp.array([0.4, 1.57], jnp.float32)
    pro_noise_std = 0.05
    pro_noise_var = pro_noise_std ** 2
    obs_noise_std = 0.2 * pro_gains
    obs_noise_var = obs_noise_std ** 2

    pos = jax.random.uniform(ks[0], (2, B), minval=-0.5, maxval=0.5, dtype=jnp.float32)
    hd = jnp.float32(np.pi / 2) + 0.3 * jax.random.normal(ks[1], (1, B), dtype=jnp.float32)
    vel = 0.2 * jax.random.normal(ks[2], (2, B), dtype=jnp.float32)
    x = jnp.concatenate([pos, hd, vel], axis=0)                      # (5, B)

    M = 0.1 * jax.random.normal(ks[3], (B, STATE_DIM, STATE_DIM), dtype=jnp.float32)
    P = 1e-8 * jnp.eye(STATE_DIM, dtype=jnp.float32)[None] + \
        jnp.einsum('bij,bkj->bik', M, M)                             # SPD per batch
    P = jnp.transpose(P, (1, 2, 0))                                  # (5, 5, B)

    a = jax.random.uniform(ks[4], (ACTION_DIM, B), minval=-1.0, maxval=1.0,
                           dtype=jnp.float32)
    o_t = 0.3 * jax.random.normal(ks[5], (OBS_DIM, B), dtype=jnp.float32)
    pvt = 0.05 * jax.random.normal(ks[6], (B,), dtype=jnp.float32)
    pwt = 0.05 * jax.random.normal(ks[7], (B,), dtype=jnp.float32)

    b_t, P_t = belief_step_pallas_batched(x, P, o_t, a, pvt, pwt, pro_gains,
                                          pro_noise_var, obs_noise_var,
                                          sublane_tile=8)
    jax.block_until_ready((b_t, P_t))

    b_ref, P_ref = belief_step_ref_batched(np.asarray(x), np.asarray(P),
                                           np.asarray(o_t), np.asarray(a),
                                           np.asarray(pvt), np.asarray(pwt),
                                           np.asarray(pro_gains), float(pro_noise_var),
                                           np.asarray(obs_noise_var))
    np.testing.assert_allclose(np.asarray(b_t), b_ref, rtol=2e-4, atol=2e-5)
    np.testing.assert_allclose(np.asarray(P_t), P_ref, rtol=2e-4, atol=2e-5)

    # single-instance wrapper (module-style signature, explicit H) sanity check
    H = np.zeros((OBS_DIM, STATE_DIM), np.float32)
    H[0, -2] = 1.0
    H[1, -1] = 1.0
    b1, P1 = belief_step_pallas((x[:, 0:1], P[:, :, 0]), o_t[:, 0:1], a[:, 0],
                                float(pvt[0]), float(pwt[0]), pro_gains,
                                pro_noise_var, obs_noise_var, H=H)
    jax.block_until_ready((b1, P1))
    np.testing.assert_allclose(np.asarray(b1)[:, 0], b_ref[:, 0], rtol=2e-4, atol=2e-5)
    np.testing.assert_allclose(np.asarray(P1), P_ref[:, :, 0], rtol=2e-4, atol=2e-5)

    print("KERNEL_OK")
</pallas_src>

<mosaic_0001>
module attributes {stable_mosaic.version = 11 : i64} {
  func.func @_ekf_kernel(%arg0: i32, %arg1: memref<7xf32, #tpu.memory_space<smem>>, %arg2: memref<5x8x128xf32, #tpu.memory_space<vmem>>, %arg3: memref<5x5x8x128xf32, #tpu.memory_space<vmem>>, %arg4: memref<2x8x128xf32, #tpu.memory_space<vmem>>, %arg5: memref<2x8x128xf32, #tpu.memory_space<vmem>>, %arg6: memref<2x8x128xf32, #tpu.memory_space<vmem>>, %arg7: memref<5x8x128xf32, #tpu.memory_space<vmem>>, %arg8: memref<5x5x8x128xf32, #tpu.memory_space<vmem>>) attributes {dimension_semantics = [#tpu.dimension_semantics<parallel>], iteration_bounds = array<i64: 2>, scalar_prefetch = 1 : i64, scratch_operands = 0 : i64, tpu.core_type = #tpu.core_type<tc>, window_params = [{transform_indices = @transform_0, window_bounds = array<i64: 5, 8, 128>}, {transform_indices = @transform_1, window_bounds = array<i64: 5, 5, 8, 128>}, {transform_indices = @transform_2, window_bounds = array<i64: 2, 8, 128>}, {transform_indices = @transform_3, window_bounds = array<i64: 2, 8, 128>}, {transform_indices = @transform_4, window_bounds = array<i64: 2, 8, 128>}, {transform_indices = @transform_5, window_bounds = array<i64: 5, 8, 128>}, {transform_indices = @transform_6, window_bounds = array<i64: 5, 5, 8, 128>}]} {
    %c0 = arith.constant 0 : index
    %0 = memref.load %arg1[%c0] : memref<7xf32, #tpu.memory_space<smem>>
    %c1 = arith.constant 1 : index
    %1 = memref.load %arg1[%c1] : memref<7xf32, #tpu.memory_space<smem>>
    %c2 = arith.constant 2 : index
    %2 = memref.load %arg1[%c2] : memref<7xf32, #tpu.memory_space<smem>>
    %c3 = arith.constant 3 : index
    %3 = memref.load %arg1[%c3] : memref<7xf32, #tpu.memory_space<smem>>
    %c4 = arith.constant 4 : index
    %4 = memref.load %arg1[%c4] : memref<7xf32, #tpu.memory_space<smem>>
    %c5 = arith.constant 5 : index
    %5 = memref.load %arg1[%c5] : memref<7xf32, #tpu.memory_space<smem>>
    %c6 = arith.constant 6 : index
    %6 = memref.load %arg1[%c6] : memref<7xf32, #tpu.memory_space<smem>>
    %c0_0 = arith.constant 0 : index
    %c0_1 = arith.constant 0 : index
    %c0_2 = arith.constant 0 : index
    %7 = vector.load %arg2[%c0_0, %c0_1, %c0_2] : memref<5x8x128xf32, #tpu.memory_space<vmem>>, vector<1x8x128xf32>
    %8 = vector.shape_cast %7 : vector<1x8x128xf32> to vector<8x128xf32>
    %c1_3 = arith.constant 1 : index
    %c0_4 = arith.constant 0 : index
    %c0_5 = arith.constant 0 : index
    %9 = vector.load %arg2[%c1_3, %c0_4, %c0_5] : memref<5x8x128xf32, #tpu.memory_space<vmem>>, vector<1x8x128xf32>
    %10 = vector.shape_cast %9 : vector<1x8x128xf32> to vector<8x128xf32>
    %c2_6 = arith.constant 2 : index
    %c0_7 = arith.constant 0 : index
    %c0_8 = arith.constant 0 : index
    %11 = vector.load %arg2[%c2_6, %c0_7, %c0_8] : memref<5x8x128xf32, #tpu.memory_space<vmem>>, vector<1x8x128xf32>
    %12 = vector.shape_cast %11 : vector<1x8x128xf32> to vector<8x128xf32>
    %c3_9 = arith.constant 3 : index
    %c0_10 = arith.constant 0 : index
    %c0_11 = arith.constant 0 : index
    %13 = vector.load %arg2[%c3_9, %c0_10, %c0_11] : memref<5x8x128xf32, #tpu.memory_space<vmem>>, vector<1x8x128xf32>
    %14 = vector.shape_cast %13 : vector<1x8x128xf32> to vector<8x128xf32>
    %c4_12 = arith.constant 4 : index
    %c0_13 = arith.constant 0 : index
    %c0_14 = arith.constant 0 : index
    %15 = vector.load %arg2[%c4_12, %c0_13, %c0_14] : memref<5x8x128xf32, #tpu.memory_space<vmem>>, vector<1x8x128xf32>
    %16 = vector.shape_cast %15 : vector<1x8x128xf32> to vector<8x128xf32>
    %17 = math.cos %12 : vector<8x128xf32>
    %18 = math.sin %12 : vector<8x128xf32>
    %19 = vector.broadcast %2 : f32 to vector<8x128xf32>
    %20 = arith.mulf %14, %19 : vector<8x128xf32>
    %21 = arith.mulf %20, %17 : vector<8x128xf32>
    %22 = arith.addf %8, %21 : vector<8x128xf32>
    %c0_15 = arith.constant 0 : index
    %c0_16 = arith.constant 0 : index
    %c0_17 = arith.constant 0 : index
    %23 = vector.load %arg7[%c0_15, %c0_16, %c0_17] : memref<5x8x128xf32, #tpu.memory_space<vmem>>, vector<1x8x128xf32>
    %24 = vector.shape_cast %23 : vector<1x8x128xf32> to vector<8x128xf32>
    %25 = vector.shape_cast %22 : vector<8x128xf32> to vector<1x8x128xf32>
    tpu.vector_store %arg7[%c0_15, %c0_16, %c0_17], %25 {strides = array<i32>} : memref<5x8x128xf32, #tpu.memory_space<vmem>>, vector<1x8x128xf32>,
    %26 = arith.mulf %20, %18 : vector<8x128xf32>
    %27 = arith.addf %10, %26 : vector<8x128xf32>
    %c1_18 = arith.constant 1 : index
    %c0_19 = arith.constant 0 : index
    %c0_20 = arith.constant 0 : index
    %28 = vector.load %arg7[%c1_18, %c0_19, %c0_20] : memref<5x8x128xf32, #tpu.memory_space<vmem>>, vector<1x8x128xf32>
    %29 = vector.shape_cast %28 : vector<1x8x128xf32> to vector<8x128xf32>
    %30 = vector.shape_cast %27 : vector<8x128xf32> to vector<1x8x128xf32>
    tpu.vector_store %arg7[%c1_18, %c0_19, %c0_20], %30 {strides = array<i32>} : memref<5x8x128xf32, #tpu.memory_space<vmem>>, vector<1x8x128xf32>,
    %31 = vector.broadcast %2 : f32 to vector<8x128xf32>
    %32 = arith.mulf %16, %31 : vector<8x128xf32>
    %33 = arith.addf %12, %32 : vector<8x128xf32>
    %c2_21 = arith.constant 2 : index
    %c0_22 = arith.constant 0 : index
    %c0_23 = arith.constant 0 : index
    %34 = vector.load %arg7[%c2_21, %c0_22, %c0_23] : memref<5x8x128xf32, #tpu.memory_space<vmem>>, vector<1x8x128xf32>
    %35 = vector.shape_cast %34 : vector<1x8x128xf32> to vector<8x128xf32>
    %36 = vector.shape_cast %33 : vector<8x128xf32> to vector<1x8x128xf32>
    tpu.vector_store %arg7[%c2_21, %c0_22, %c0_23], %36 {strides = array<i32>} : memref<5x8x128xf32, #tpu.memory_space<vmem>>, vector<1x8x128xf32>,
    %c0_24 = arith.constant 0 : index
    %c0_25 = arith.constant 0 : index
    %c0_26 = arith.constant 0 : index
    %37 = vector.load %arg5[%c0_24, %c0_25, %c0_26] : memref<2x8x128xf32, #tpu.memory_space<vmem>>, vector<1x8x128xf32>
    %38 = vector.shape_cast %37 : vector<1x8x128xf32> to vector<8x128xf32>
    %39 = vector.broadcast %0 : f32 to vector<8x128xf32>
    %40 = arith.mulf %39, %38 : vector<8x128xf32>
    %c0_27 = arith.constant 0 : index
    %c0_28 = arith.constant 0 : index
    %c0_29 = arith.constant 0 : index
    %41 = vector.load %arg6[%c0_27, %c0_28, %c0_29] : memref<2x8x128xf32, #tpu.memory_space<vmem>>, vector<1x8x128xf32>
    %42 = vector.shape_cast %41 : vector<1x8x128xf32> to vector<8x128xf32>
    %43 = arith.addf %40, %42 : vector<8x128xf32>
    %c1_30 = arith.constant 1 : index
    %c0_31 = arith.constant 0 : index
    %c0_32 = arith.constant 0 : index
    %44 = vector.load %arg5[%c1_30, %c0_31, %c0_32] : memref<2x8x128xf32, #tpu.memory_space<vmem>>, vector<1x8x128xf32>
    %45 = vector.shape_cast %44 : vector<1x8x128xf32> to vector<8x128xf32>
    %46 = vector.broadcast %1 : f32 to vector<8x128xf32>
    %47 = arith.mulf %46, %45 : vector<8x128xf32>
    %c1_33 = arith.constant 1 : index
    %c0_34 = arith.constant 0 : index
    %c0_35 = arith.constant 0 : index
    %48 = vector.load %arg6[%c1_33, %c0_34, %c0_35] : memref<2x8x128xf32, #tpu.memory_space<vmem>>, vector<1x8x128xf32>
    %49 = vector.shape_cast %48 : vector<1x8x128xf32> to vector<8x128xf32>
    %50 = arith.addf %47, %49 : vector<8x128xf32>
    %c0_36 = arith.constant 0 : index
    %c0_37 = arith.constant 0 : index
    %c0_38 = arith.constant 0 : index
    %51 = vector.load %arg4[%c0_36, %c0_37, %c0_38] : memref<2x8x128xf32, #tpu.memory_space<vmem>>, vector<1x8x128xf32>
    %52 = vector.shape_cast %51 : vector<1x8x128xf32> to vector<8x128xf32>
    %53 = arith.subf %52, %43 : vector<8x128xf32>
    %54 = vector.broadcast %3 : f32 to vector<8x128xf32>
    %55 = arith.mulf %54, %53 : vector<8x128xf32>
    %56 = arith.addf %43, %55 : vector<8x128xf32>
    %c3_39 = arith.constant 3 : index
    %c0_40 = arith.constant 0 : index
    %c0_41 = arith.constant 0 : index
    %57 = vector.load %arg7[%c3_39, %c0_40, %c0_41] : memref<5x8x128xf32, #tpu.memory_space<vmem>>, vector<1x8x128xf32>
    %58 = vector.shape_cast %57 : vector<1x8x128xf32> to vector<8x128xf32>
    %59 = vector.shape_cast %56 : vector<8x128xf32> to vector<1x8x128xf32>
    tpu.vector_store %arg7[%c3_39, %c0_40, %c0_41], %59 {strides = array<i32>} : memref<5x8x128xf32, #tpu.memory_space<vmem>>, vector<1x8x128xf32>,
    %c1_42 = arith.constant 1 : index
    %c0_43 = arith.constant 0 : index
    %c0_44 = arith.constant 0 : index
    %60 = vector.load %arg4[%c1_42, %c0_43, %c0_44] : memref<2x8x128xf32, #tpu.memory_space<vmem>>, vector<1x8x128xf32>
    %61 = vector.shape_cast %60 : vector<1x8x128xf32> to vector<8x128xf32>
    %62 = arith.subf %61, %50 : vector<8x128xf32>
    %63 = vector.broadcast %4 : f32 to vector<8x128xf32>
    %64 = arith.mulf %63, %62 : vector<8x128xf32>
    %65 = arith.addf %50, %64 : vector<8x128xf32>
    %c4_45 = arith.constant 4 : index
    %c0_46 = arith.constant 0 : index
    %c0_47 = arith.constant 0 : index
    %66 = vector.load %arg7[%c4_45, %c0_46, %c0_47] : memref<5x8x128xf32, #tpu.memory_space<vmem>>, vector<1x8x128xf32>
    %67 = vector.shape_cast %66 : vector<1x8x128xf32> to vector<8x128xf32>
    %68 = vector.shape_cast %65 : vector<8x128xf32> to vector<1x8x128xf32>
    tpu.vector_store %arg7[%c4_45, %c0_46, %c0_47], %68 {strides = array<i32>} : memref<5x8x128xf32, #tpu.memory_space<vmem>>, vector<1x8x128xf32>,
    %cst = arith.constant 0.000000e+00 : f32
    %69 = vector.broadcast %cst : f32 to vector<8x128xf32>
    %70 = arith.subf %69, %20 : vector<8x128xf32>
    %71 = arith.mulf %70, %18 : vector<8x128xf32>
    %72 = vector.broadcast %2 : f32 to vector<8x128xf32>
    %73 = arith.mulf %17, %72 : vector<8x128xf32>
    %74 = arith.mulf %20, %17 : vector<8x128xf32>
    %75 = vector.broadcast %2 : f32 to vector<8x128xf32>
    %76 = arith.mulf %18, %75 : vector<8x128xf32>
    %cst_48 = arith.constant 0.000000e+00 : f32
    %77 = vector.broadcast %cst_48 : f32 to vector<8x128xf32>
    %c0_49 = arith.constant 0 : index
    %c0_50 = arith.constant 0 : index
    %c0_51 = arith.constant 0 : index
    %c0_52 = arith.constant 0 : index
    %78 = vector.load %arg3[%c0_49, %c0_50, %c0_51, %c0_52] : memref<5x5x8x128xf32, #tpu.memory_space<vmem>>, vector<1x1x8x128xf32>
    %79 = vector.shape_cast %78 : vector<1x1x8x128xf32> to vector<8x128xf32>
    %c2_53 = arith.constant 2 : index
    %c0_54 = arith.constant 0 : index
    %c0_55 = arith.constant 0 : index
    %c0_56 = arith.constant 0 : index
    %80 = vector.load %arg3[%c2_53, %c0_54, %c0_55, %c0_56] : memref<5x5x8x128xf32, #tpu.memory_space<vmem>>, vector<1x1x8x128xf32>
    %81 = vector.shape_cast %80 : vector<1x1x8x128xf32> to vector<8x128xf32>
    %82 = arith.mulf %71, %81 : vector<8x128xf32>
    %83 = arith.addf %79, %82 : vector<8x128xf32>
    %c3_57 = arith.constant 3 : index
    %c0_58 = arith.constant 0 : index
    %c0_59 = arith.constant 0 : index
    %c0_60 = arith.constant 0 : index
    %84 = vector.load %arg3[%c3_57, %c0_58, %c0_59, %c0_60] : memref<5x5x8x128xf32, #tpu.memory_space<vmem>>, vector<1x1x8x128xf32>
    %85 = vector.shape_cast %84 : vector<1x1x8x128xf32> to vector<8x128xf32>
    %86 = arith.mulf %73, %85 : vector<8x128xf32>
    %87 = arith.addf %83, %86 : vector<8x128xf32>
    %c0_61 = arith.constant 0 : index
    %c1_62 = arith.constant 1 : index
    %c0_63 = arith.constant 0 : index
    %c0_64 = arith.constant 0 : index
    %88 = vector.load %arg3[%c0_61, %c1_62, %c0_63, %c0_64] : memref<5x5x8x128xf32, #tpu.memory_space<vmem>>, vector<1x1x8x128xf32>
    %89 = vector.shape_cast %88 : vector<1x1x8x128xf32> to vector<8x128xf32>
    %c2_65 = arith.constant 2 : index
    %c1_66 = arith.constant 1 : index
    %c0_67 = arith.constant 0 : index
    %c0_68 = arith.constant 0 : index
    %90 = vector.load %arg3[%c2_65, %c1_66, %c0_67, %c0_68] : memref<5x5x8x128xf32, #tpu.memory_space<vmem>>, vector<1x1x8x128xf32>
    %91 = vector.shape_cast %90 : vector<1x1x8x128xf32> to vector<8x128xf32>
    %92 = arith.mulf %71, %91 : vector<8x128xf32>
    %93 = arith.addf %89, %92 : vector<8x128xf32>
    %c3_69 = arith.constant 3 : index
    %c1_70 = arith.constant 1 : index
    %c0_71 = arith.constant 0 : index
    %c0_72 = arith.constant 0 : index
    %94 = vector.load %arg3[%c3_69, %c1_70, %c0_71, %c0_72] : memref<5x5x8x128xf32, #tpu.memory_space<vmem>>, vector<1x1x8x128xf32>
    %95 = vector.shape_cast %94 : vector<1x1x8x128xf32> to vector<8x128xf32>
    %96 = arith.mulf %73, %95 : vector<8x128xf32>
    %97 = arith.addf %93, %96 : vector<8x128xf32>
    %c0_73 = arith.constant 0 : index
    %c2_74 = arith.constant 2 : index
    %c0_75 = arith.constant 0 : index
    %c0_76 = arith.constant 0 : index
    %98 = vector.load %arg3[%c0_73, %c2_74, %c0_75, %c0_76] : memref<5x5x8x128xf32, #tpu.memory_space<vmem>>, vector<1x1x8x128xf32>
    %99 = vector.shape_cast %98 : vector<1x1x8x128xf32> to vector<8x128xf32>
    %c2_77 = arith.constant 2 : index
    %c2_78 = arith.constant 2 : index
    %c0_79 = arith.constant 0 : index
    %c0_80 = arith.constant 0 : index
    %100 = vector.load %arg3[%c2_77, %c2_78, %c0_79, %c0_80] : memref<5x5x8x128xf32, #tpu.memory_space<vmem>>, vector<1x1x8x128xf32>
    %101 = vector.shape_cast %100 : vector<1x1x8x128xf32> to vector<8x128xf32>
    %102 = arith.mulf %71, %101 : vector<8x128xf32>
    %103 = arith.addf %99, %102 : vector<8x128xf32>
    %c3_81 = arith.constant 3 : index
    %c2_82 = arith.constant 2 : index
    %c0_83 = arith.constant 0 : index
    %c0_84 = arith.constant 0 : index
    %104 = vector.load %arg3[%c3_81, %c2_82, %c0_83, %c0_84] : memref<5x5x8x128xf32, #tpu.memory_space<vmem>>, vector<1x1x8x128xf32>
    %105 = vector.shape_cast %104 : vector<1x1x8x128xf32> to vector<8x128xf32>
    %106 = arith.mulf %73, %105 : vector<8x128xf32>
    %107 = arith.addf %103, %106 : vector<8x128xf32>
    %c0_85 = arith.constant 0 : index
    %c3_86 = arith.constant 3 : index
    %c0_87 = arith.constant 0 : index
    %c0_88 = arith.constant 0 : index
    %108 = vector.load %arg3[%c0_85, %c3_86, %c0_87, %c0_88] : memref<5x5x8x128xf32, #tpu.memory_space<vmem>>, vector<1x1x8x128xf32>
    %109 = vector.shape_cast %108 : vector<1x1x8x128xf32> to vector<8x128xf32>
    %c2_89 = arith.constant 2 : index
    %c3_90 = arith.constant 3 : index
    %c0_91 = arith.constant 0 : index
    %c0_92 = arith.constant 0 : index
    %110 = vector.load %arg3[%c2_89, %c3_90, %c0_91, %c0_92] : memref<5x5x8x128xf32, #tpu.memory_space<vmem>>, vector<1x1x8x128xf32>
    %111 = vector.shape_cast %110 : vector<1x1x8x128xf32> to vector<8x128xf32>
    %112 = arith.mulf %71, %111 : vector<8x128xf32>
    %113 = arith.addf %109, %112 : vector<8x128xf32>
    %c3_93 = arith.constant 3 : index
    %c3_94 = arith.constant 3 : index
    %c0_95 = arith.constant 0 : index
    %c0_96 = arith.constant 0 : index
    %114 = vector.load %arg3[%c3_93, %c3_94, %c0_95, %c0_96] : memref<5x5x8x128xf32, #tpu.memory_space<vmem>>, vector<1x1x8x128xf32>
    %115 = vector.shape_cast %114 : vector<1x1x8x128xf32> to vector<8x128xf32>
    %116 = arith.mulf %73, %115 : vector<8x128xf32>
    %117 = arith.addf %113, %116 : vector<8x128xf32>
    %c0_97 = arith.constant 0 : index
    %c4_98 = arith.constant 4 : index
    %c0_99 = arith.constant 0 : index
    %c0_100 = arith.constant 0 : index
    %118 = vector.load %arg3[%c0_97, %c4_98, %c0_99, %c0_100] : memref<5x5x8x128xf32, #tpu.memory_space<vmem>>, vector<1x1x8x128xf32>
    %119 = vector.shape_cast %118 : vector<1x1x8x128xf32> to vector<8x128xf32>
    %c2_101 = arith.constant 2 : index
    %c4_102 = arith.constant 4 : index
    %c0_103 = arith.constant 0 : index
    %c0_104 = arith.constant 0 : index
    %120 = vector.load %arg3[%c2_101, %c4_102, %c0_103, %c0_104] : memref<5x5x8x128xf32, #tpu.memory_space<vmem>>, vector<1x1x8x128xf32>
    %121 = vector.shape_cast %120 : vector<1x1x8x128xf32> to vector<8x128xf32>
    %122 = arith.mulf %71, %121 : vector<8x128xf32>
    %123 = arith.addf %119, %122 : vector<8x128xf32>
    %c3_105 = arith.constant 3 : index
    %c4_106 = arith.constant 4 : index
    %c0_107 = arith.constant 0 : index
    %c0_108 = arith.constant 0 : index
    %124 = vector.load %arg3[%c3_105, %c4_106, %c0_107, %c0_108] : memref<5x5x8x128xf32, #tpu.memory_space<vmem>>, vector<1x1x8x128xf32>
    %125 = vector.shape_cast %124 : vector<1x1x8x128xf32> to vector<8x128xf32>
    %126 = arith.mulf %73, %125 : vector<8x128xf32>
    %127 = arith.addf %123, %126 : vector<8x128xf32>
    %128 = arith.mulf %71, %107 : vector<8x128xf32>
    %129 = arith.addf %87, %128 : vector<8x128xf32>
    %130 = arith.mulf %73, %117 : vector<8x128xf32>
    %131 = arith.addf %129, %130 : vector<8x128xf32>
    %c0_109 = arith.constant 0 : index
    %c0_110 = arith.constant 0 : index
    %c0_111 = arith.constant 0 : index
    %c0_112 = arith.constant 0 : index
    %132 = vector.load %arg8[%c0_109, %c0_110, %c0_111, %c0_112] : memref<5x5x8x128xf32, #tpu.memory_space<vmem>>, vector<1x1x8x128xf32>
    %133 = vector.shape_cast %132 : vector<1x1x8x128xf32> to vector<8x128xf32>
    %134 = vector.shape_cast %131 : vector<8x128xf32> to vector<1x1x8x128xf32>
    tpu.vector_store %arg8[%c0_109, %c0_110, %c0_111, %c0_112], %134 {strides = array<i32>} : memref<5x5x8x128xf32, #tpu.memory_space<vmem>>, vector<1x1x8x128xf32>,
    %135 = arith.mulf %74, %107 : vector<8x128xf32>
    %136 = arith.addf %97, %135 : vector<8x128xf32>
    %137 = arith.mulf %76, %117 : vector<8x128xf32>
    %138 = arith.addf %136, %137 : vector<8x128xf32>
    %c0_113 = arith.constant 0 : index
    %c1_114 = arith.constant 1 : index
    %c0_115 = arith.constant 0 : index
    %c0_116 = arith.constant 0 : index
    %139 = vector.load %arg8[%c0_113, %c1_114, %c0_115, %c0_116] : memref<5x5x8x128xf32, #tpu.memory_space<vmem>>, vector<1x1x8x128xf32>
    %140 = vector.shape_cast %139 : vector<1x1x8x128xf32> to vector<8x128xf32>
    %141 = vector.shape_cast %138 : vector<8x128xf32> to vector<1x1x8x128xf32>
    tpu.vector_store %arg8[%c0_113, %c1_114, %c0_115, %c0_116], %141 {strides = array<i32>} : memref<5x5x8x128xf32, #tpu.memory_space<vmem>>, vector<1x1x8x128xf32>,
    %142 = vector.broadcast %2 : f32 to vector<8x128xf32>
    %143 = arith.mulf %142, %127 : vector<8x128xf32>
    %144 = arith.addf %107, %143 : vector<8x128xf32>
    %c0_117 = arith.constant 0 : index
    %c2_118 = arith.constant 2 : index
    %c0_119 = arith.constant 0 : index
    %c0_120 = arith.constant 0 : index
    %145 = vector.load %arg8[%c0_117, %c2_118, %c0_119, %c0_120] : memref<5x5x8x128xf32, #tpu.memory_space<vmem>>, vector<1x1x8x128xf32>
    %146 = vector.shape_cast %145 : vector<1x1x8x128xf32> to vector<8x128xf32>
    %147 = vector.shape_cast %144 : vector<8x128xf32> to vector<1x1x8x128xf32>
    tpu.vector_store %arg8[%c0_117, %c2_118, %c0_119, %c0_120], %147 {strides = array<i32>} : memref<5x5x8x128xf32, #tpu.memory_space<vmem>>, vector<1x1x8x128xf32>,
    %c0_121 = arith.constant 0 : index
    %c3_122 = arith.constant 3 : index
    %c0_123 = arith.constant 0 : index
    %c0_124 = arith.constant 0 : index
    %148 = vector.load %arg8[%c0_121, %c3_122, %c0_123, %c0_124] : memref<5x5x8x128xf32, #tpu.memory_space<vmem>>, vector<1x1x8x128xf32>
    %149 = vector.shape_cast %148 : vector<1x1x8x128xf32> to vector<8x128xf32>
    %150 = vector.shape_cast %77 : vector<8x128xf32> to vector<1x1x8x128xf32>
    tpu.vector_store %arg8[%c0_121, %c3_122, %c0_123, %c0_124], %150 {strides = array<i32>} : memref<5x5x8x128xf32, #tpu.memory_space<vmem>>, vector<1x1x8x128xf32>,
    %c0_125 = arith.constant 0 : index
    %c4_126 = arith.constant 4 : index
    %c0_127 = arith.constant 0 : index
    %c0_128 = arith.constant 0 : index
    %151 = vector.load %arg8[%c0_125, %c4_126, %c0_127, %c0_128] : memref<5x5x8x128xf32, #tpu.memory_space<vmem>>, vector<1x1x8x128xf32>
    %152 = vector.shape_cast %151 : vector<1x1x8x128xf32> to vector<8x128xf32>
    %153 = vector.shape_cast %77 : vector<8x128xf32> to vector<1x1x8x128xf32>
    tpu.vector_store %arg8[%c0_125, %c4_126, %c0_127, %c0_128], %153 {strides = array<i32>} : memref<5x5x8x128xf32, #tpu.memory_space<vmem>>, vector<1x1x8x128xf32>,
    %c1_129 = arith.constant 1 : index
    %c0_130 = arith.constant 0 : index
    %c0_131 = arith.constant 0 : index
    %c0_132 = arith.constant 0 : index
    %154 = vector.load %arg3[%c1_129, %c0_130, %c0_131, %c0_132] : memref<5x5x8x128xf32, #tpu.memory_space<vmem>>, vector<1x1x8x128xf32>
    %155 = vector.shape_cast %154 : vector<1x1x8x128xf32> to vector<8x128xf32>
    %c2_133 = arith.constant 2 : index
    %c0_134 = arith.constant 0 : index
    %c0_135 = arith.constant 0 : index
    %c0_136 = arith.constant 0 : index
    %156 = vector.load %arg3[%c2_133, %c0_134, %c0_135, %c0_136] : memref<5x5x8x128xf32, #tpu.memory_space<vmem>>, vector<1x1x8x128xf32>
    %157 = vector.shape_cast %156 : vector<1x1x8x128xf32> to vector<8x128xf32>
    %158 = arith.mulf %74, %157 : vector<8x128xf32>
    %159 = arith.addf %155, %158 : vector<8x128xf32>
    %c3_137 = arith.constant 3 : index
    %c0_138 = arith.constant 0 : index
    %c0_139 = arith.constant 0 : index
    %c0_140 = arith.constant 0 : index
    %160 = vector.load %arg3[%c3_137, %c0_138, %c0_139, %c0_140] : memref<5x5x8x128xf32, #tpu.memory_space<vmem>>, vector<1x1x8x128xf32>
    %161 = vector.shape_cast %160 : vector<1x1x8x128xf32> to vector<8x128xf32>
    %162 = arith.mulf %76, %161 : vector<8x128xf32>
    %163 = arith.addf %159, %162 : vector<8x128xf32>
    %c1_141 = arith.constant 1 : index
    %c1_142 = arith.constant 1 : index
    %c0_143 = arith.constant 0 : index
    %c0_144 = arith.constant 0 : index
    %164 = vector.load %arg3[%c1_141, %c1_142, %c0_143, %c0_144] : memref<5x5x8x128xf32, #tpu.memory_space<vmem>>, vector<1x1x8x128xf32>
    %165 = vector.shape_cast %164 : vector<1x1x8x128xf32> to vector<8x128xf32>
    %c2_145 = arith.constant 2 : index
    %c1_146 = arith.constant 1 : index
    %c0_147 = arith.constant 0 : index
    %c0_148 = arith.constant 0 : index
    %166 = vector.load %arg3[%c2_145, %c1_146, %c0_147, %c0_148] : memref<5x5x8x128xf32, #tpu.memory_space<vmem>>, vector<1x1x8x128xf32>
    %167 = vector.shape_cast %166 : vector<1x1x8x128xf32> to vector<8x128xf32>
    %168 = arith.mulf %74, %167 : vector<8x128xf32>
    %169 = arith.addf %165, %168 : vector<8x128xf32>
    %c3_149 = arith.constant 3 : index
    %c1_150 = arith.constant 1 : index
    %c0_151 = arith.constant 0 : index
    %c0_152 = arith.constant 0 : index
    %170 = vector.load %arg3[%c3_149, %c1_150, %c0_151, %c0_152] : memref<5x5x8x128xf32, #tpu.memory_space<vmem>>, vector<1x1x8x128xf32>
    %171 = vector.shape_cast %170 : vector<1x1x8x128xf32> to vector<8x128xf32>
    %172 = arith.mulf %76, %171 : vector<8x128xf32>
    %173 = arith.addf %169, %172 : vector<8x128xf32>
    %c1_153 = arith.constant 1 : index
    %c2_154 = arith.constant 2 : index
    %c0_155 = arith.constant 0 : index
    %c0_156 = arith.constant 0 : index
    %174 = vector.load %arg3[%c1_153, %c2_154, %c0_155, %c0_156] : memref<5x5x8x128xf32, #tpu.memory_space<vmem>>, vector<1x1x8x128xf32>
    %175 = vector.shape_cast %174 : vector<1x1x8x128xf32> to vector<8x128xf32>
    %c2_157 = arith.constant 2 : index
    %c2_158 = arith.constant 2 : index
    %c0_159 = arith.constant 0 : index
    %c0_160 = arith.constant 0 : index
    %176 = vector.load %arg3[%c2_157, %c2_158, %c0_159, %c0_160] : memref<5x5x8x128xf32, #tpu.memory_space<vmem>>, vector<1x1x8x128xf32>
    %177 = vector.shape_cast %176 : vector<1x1x8x128xf32> to vector<8x128xf32>
    %178 = arith.mulf %74, %177 : vector<8x128xf32>
    %179 = arith.addf %175, %178 : vector<8x128xf32>
    %c3_161 = arith.constant 3 : index
    %c2_162 = arith.constant 2 : index
    %c0_163 = arith.constant 0 : index
    %c0_164 = arith.constant 0 : index
    %180 = vector.load %arg3[%c3_161, %c2_162, %c0_163, %c0_164] : memref<5x5x8x128xf32, #tpu.memory_space<vmem>>, vector<1x1x8x128xf32>
    %181 = vector.shape_cast %180 : vector<1x1x8x128xf32> to vector<8x128xf32>
    %182 = arith.mulf %76, %181 : vector<8x128xf32>
    %183 = arith.addf %179, %182 : vector<8x128xf32>
    %c1_165 = arith.constant 1 : index
    %c3_166 = arith.constant 3 : index
    %c0_167 = arith.constant 0 : index
    %c0_168 = arith.constant 0 : index
    %184 = vector.load %arg3[%c1_165, %c3_166, %c0_167, %c0_168] : memref<5x5x8x128xf32, #tpu.memory_space<vmem>>, vector<1x1x8x128xf32>
    %185 = vector.shape_cast %184 : vector<1x1x8x128xf32> to vector<8x128xf32>
    %c2_169 = arith.constant 2 : index
    %c3_170 = arith.constant 3 : index
    %c0_171 = arith.constant 0 : index
    %c0_172 = arith.constant 0 : index
    %186 = vector.load %arg3[%c2_169, %c3_170, %c0_171, %c0_172] : memref<5x5x8x128xf32, #tpu.memory_space<vmem>>, vector<1x1x8x128xf32>
    %187 = vector.shape_cast %186 : vector<1x1x8x128xf32> to vector<8x128xf32>
    %188 = arith.mulf %74, %187 : vector<8x128xf32>
    %189 = arith.addf %185, %188 : vector<8x128xf32>
    %c3_173 = arith.constant 3 : index
    %c3_174 = arith.constant 3 : index
    %c0_175 = arith.constant 0 : index
    %c0_176 = arith.constant 0 : index
    %190 = vector.load %arg3[%c3_173, %c3_174, %c0_175, %c0_176] : memref<5x5x8x128xf32, #tpu.memory_space<vmem>>, vector<1x1x8x128xf32>
    %191 = vector.shape_cast %190 : vector<1x1x8x128xf32> to vector<8x128xf32>
    %192 = arith.mulf %76, %191 : vector<8x128xf32>
    %193 = arith.addf %189, %192 : vector<8x128xf32>
    %c1_177 = arith.constant 1 : index
    %c4_178 = arith.constant 4 : index
    %c0_179 = arith.constant 0 : index
    %c0_180 = arith.constant 0 : index
    %194 = vector.load %arg3[%c1_177, %c4_178, %c0_179, %c0_180] : memref<5x5x8x128xf32, #tpu.memory_space<vmem>>, vector<1x1x8x128xf32>
    %195 = vector.shape_cast %194 : vector<1x1x8x128xf32> to vector<8x128xf32>
    %c2_181 = arith.constant 2 : index
    %c4_182 = arith.constant 4 : index
    %c0_183 = arith.constant 0 : index
    %c0_184 = arith.constant 0 : index
    %196 = vector.load %arg3[%c2_181, %c4_182, %c0_183, %c0_184] : memref<5x5x8x128xf32, #tpu.memory_space<vmem>>, vector<1x1x8x128xf32>
    %197 = vector.shape_cast %196 : vector<1x1x8x128xf32> to vector<8x128xf32>
    %198 = arith.mulf %74, %197 : vector<8x128xf32>
    %199 = arith.addf %195, %198 : vector<8x128xf32>
    %c3_185 = arith.constant 3 : index
    %c4_186 = arith.constant 4 : index
    %c0_187 = arith.constant 0 : index
    %c0_188 = arith.constant 0 : index
    %200 = vector.load %arg3[%c3_185, %c4_186, %c0_187, %c0_188] : memref<5x5x8x128xf32, #tpu.memory_space<vmem>>, vector<1x1x8x128xf32>
    %201 = vector.shape_cast %200 : vector<1x1x8x128xf32> to vector<8x128xf32>
    %202 = arith.mulf %76, %201 : vector<8x128xf32>
    %203 = arith.addf %199, %202 : vector<8x128xf32>
    %204 = arith.mulf %71, %183 : vector<8x128xf32>
    %205 = arith.addf %163, %204 : vector<8x128xf32>
    %206 = arith.mulf %73, %193 : vector<8x128xf32>
    %207 = arith.addf %205, %206 : vector<8x128xf32>
    %c1_189 = arith.constant 1 : index
    %c0_190 = arith.constant 0 : index
    %c0_191 = arith.constant 0 : index
    %c0_192 = arith.constant 0 : index
    %208 = vector.load %arg8[%c1_189, %c0_190, %c0_191, %c0_192] : memref<5x5x8x128xf32, #tpu.memory_space<vmem>>, vector<1x1x8x128xf32>
    %209 = vector.shape_cast %208 : vector<1x1x8x128xf32> to vector<8x128xf32>
    %210 = vector.shape_cast %207 : vector<8x128xf32> to vector<1x1x8x128xf32>
    tpu.vector_store %arg8[%c1_189, %c0_190, %c0_191, %c0_192], %210 {strides = array<i32>} : memref<5x5x8x128xf32, #tpu.memory_space<vmem>>, vector<1x1x8x128xf32>,
    %211 = arith.mulf %74, %183 : vector<8x128xf32>
    %212 = arith.addf %173, %211 : vector<8x128xf32>
    %213 = arith.mulf %76, %193 : vector<8x128xf32>
    %214 = arith.addf %212, %213 : vector<8x128xf32>
    %c1_193 = arith.constant 1 : index
    %c1_194 = arith.constant 1 : index
    %c0_195 = arith.constant 0 : index
    %c0_196 = arith.constant 0 : index
    %215 = vector.load %arg8[%c1_193, %c1_194, %c0_195, %c0_196] : memref<5x5x8x128xf32, #tpu.memory_space<vmem>>, vector<1x1x8x128xf32>
    %216 = vector.shape_cast %215 : vector<1x1x8x128xf32> to vector<8x128xf32>
    %217 = vector.shape_cast %214 : vector<8x128xf32> to vector<1x1x8x128xf32>
    tpu.vector_store %arg8[%c1_193, %c1_194, %c0_195, %c0_196], %217 {strides = array<i32>} : memref<5x5x8x128xf32, #tpu.memory_space<vmem>>, vector<1x1x8x128xf32>,
    %218 = vector.broadcast %2 : f32 to vector<8x128xf32>
    %219 = arith.mulf %218, %203 : vector<8x128xf32>
    %220 = arith.addf %183, %219 : vector<8x128xf32>
    %c1_197 = arith.constant 1 : index
    %c2_198 = arith.constant 2 : index
    %c0_199 = arith.constant 0 : index
    %c0_200 = arith.constant 0 : index
    %221 = vector.load %arg8[%c1_197, %c2_198, %c0_199, %c0_200] : memref<5x5x8x128xf32, #tpu.memory_space<vmem>>, vector<1x1x8x128xf32>
    %222 = vector.shape_cast %221 : vector<1x1x8x128xf32> to vector<8x128xf32>
    %223 = vector.shape_cast %220 : vector<8x128xf32> to vector<1x1x8x128xf32>
    tpu.vector_store %arg8[%c1_197, %c2_198, %c0_199, %c0_200], %223 {strides = array<i32>} : memref<5x5x8x128xf32, #tpu.memory_space<vmem>>, vector<1x1x8x128xf32>,
    %c1_201 = arith.constant 1 : index
    %c3_202 = arith.constant 3 : index
    %c0_203 = arith.constant 0 : index
    %c0_204 = arith.constant 0 : index
    %224 = vector.load %arg8[%c1_201, %c3_202, %c0_203, %c0_204] : memref<5x5x8x128xf32, #tpu.memory_space<vmem>>, vector<1x1x8x128xf32>
    %225 = vector.shape_cast %224 : vector<1x1x8x128xf32> to vector<8x128xf32>
    %226 = vector.shape_cast %77 : vector<8x128xf32> to vector<1x1x8x128xf32>
    tpu.vector_store %arg8[%c1_201, %c3_202, %c0_203, %c0_204], %226 {strides = array<i32>} : memref<5x5x8x128xf32, #tpu.memory_space<vmem>>, vector<1x1x8x128xf32>,
    %c1_205 = arith.constant 1 : index
    %c4_206 = arith.constant 4 : index
    %c0_207 = arith.constant 0 : index
    %c0_208 = arith.constant 0 : index
    %227 = vector.load %arg8[%c1_205, %c4_206, %c0_207, %c0_208] : memref<5x5x8x128xf32, #tpu.memory_space<vmem>>, vector<1x1x8x128xf32>
    %228 = vector.shape_cast %227 : vector<1x1x8x128xf32> to vector<8x128xf32>
    %229 = vector.shape_cast %77 : vector<8x128xf32> to vector<1x1x8x128xf32>
    tpu.vector_store %arg8[%c1_205, %c4_206, %c0_207, %c0_208], %229 {strides = array<i32>} : memref<5x5x8x128xf32, #tpu.memory_space<vmem>>, vector<1x1x8x128xf32>,
    %c2_209 = arith.constant 2 : index
    %c0_210 = arith.constant 0 : index
    %c0_211 = arith.constant 0 : index
    %c0_212 = arith.constant 0 : index
    %230 = vector.load %arg3[%c2_209, %c0_210, %c0_211, %c0_212] : memref<5x5x8x128xf32, #tpu.memory_space<vmem>>, vector<1x1x8x128xf32>
    %231 = vector.shape_cast %230 : vector<1x1x8x128xf32> to vector<8x128xf32>
    %c4_213 = arith.constant 4 : index
    %c0_214 = arith.constant 0 : index
    %c0_215 = arith.constant 0 : index
    %c0_216 = arith.constant 0 : index
    %232 = vector.load %arg3[%c4_213, %c0_214, %c0_215, %c0_216] : memref<5x5x8x128xf32, #tpu.memory_space<vmem>>, vector<1x1x8x128xf32>
    %233 = vector.shape_cast %232 : vector<1x1x8x128xf32> to vector<8x128xf32>
    %234 = vector.broadcast %2 : f32 to vector<8x128xf32>
    %235 = arith.mulf %234, %233 : vector<8x128xf32>
    %236 = arith.addf %231, %235 : vector<8x128xf32>
    %c2_217 = arith.constant 2 : index
    %c1_218 = arith.constant 1 : index
    %c0_219 = arith.constant 0 : index
    %c0_220 = arith.constant 0 : index
    %237 = vector.load %arg3[%c2_217, %c1_218, %c0_219, %c0_220] : memref<5x5x8x128xf32, #tpu.memory_space<vmem>>, vector<1x1x8x128xf32>
    %238 = vector.shape_cast %237 : vector<1x1x8x128xf32> to vector<8x128xf32>
    %c4_221 = arith.constant 4 : index
    %c1_222 = arith.constant 1 : index
    %c0_223 = arith.constant 0 : index
    %c0_224 = arith.constant 0 : index
    %239 = vector.load %arg3[%c4_221, %c1_222, %c0_223, %c0_224] : memref<5x5x8x128xf32, #tpu.memory_space<vmem>>, vector<1x1x8x128xf32>
    %240 = vector.shape_cast %239 : vector<1x1x8x128xf32> to vector<8x128xf32>
    %241 = vector.broadcast %2 : f32 to vector<8x128xf32>
    %242 = arith.mulf %241, %240 : vector<8x128xf32>
    %243 = arith.addf %238, %242 : vector<8x128xf32>
    %c2_225 = arith.constant 2 : index
    %c2_226 = arith.constant 2 : index
    %c0_227 = arith.constant 0 : index
    %c0_228 = arith.constant 0 : index
    %244 = vector.load %arg3[%c2_225, %c2_226, %c0_227, %c0_228] : memref<5x5x8x128xf32, #tpu.memory_space<vmem>>, vector<1x1x8x128xf32>
    %245 = vector.shape_cast %244 : vector<1x1x8x128xf32> to vector<8x128xf32>
    %c4_229 = arith.constant 4 : index
    %c2_230 = arith.constant 2 : index
    %c0_231 = arith.constant 0 : index
    %c0_232 = arith.constant 0 : index
    %246 = vector.load %arg3[%c4_229, %c2_230, %c0_231, %c0_232] : memref<5x5x8x128xf32, #tpu.memory_space<vmem>>, vector<1x1x8x128xf32>
    %247 = vector.shape_cast %246 : vector<1x1x8x128xf32> to vector<8x128xf32>
    %248 = vector.broadcast %2 : f32 to vector<8x128xf32>
    %249 = arith.mulf %248, %247 : vector<8x128xf32>
    %250 = arith.addf %245, %249 : vector<8x128xf32>
    %c2_233 = arith.constant 2 : index
    %c3_234 = arith.constant 3 : index
    %c0_235 = arith.constant 0 : index
    %c0_236 = arith.constant 0 : index
    %251 = vector.load %arg3[%c2_233, %c3_234, %c0_235, %c0_236] : memref<5x5x8x128xf32, #tpu.memory_space<vmem>>, vector<1x1x8x128xf32>
    %252 = vector.shape_cast %251 : vector<1x1x8x128xf32> to vector<8x128xf32>
    %c4_237 = arith.constant 4 : index
    %c3_238 = arith.constant 3 : index
    %c0_239 = arith.constant 0 : index
    %c0_240 = arith.constant 0 : index
    %253 = vector.load %arg3[%c4_237, %c3_238, %c0_239, %c0_240] : memref<5x5x8x128xf32, #tpu.memory_space<vmem>>, vector<1x1x8x128xf32>
    %254 = vector.shape_cast %253 : vector<1x1x8x128xf32> to vector<8x128xf32>
    %255 = vector.broadcast %2 : f32 to vector<8x128xf32>
    %256 = arith.mulf %255, %254 : vector<8x128xf32>
    %257 = arith.addf %252, %256 : vector<8x128xf32>
    %c2_241 = arith.constant 2 : index
    %c4_242 = arith.constant 4 : index
    %c0_243 = arith.constant 0 : index
    %c0_244 = arith.constant 0 : index
    %258 = vector.load %arg3[%c2_241, %c4_242, %c0_243, %c0_244] : memref<5x5x8x128xf32, #tpu.memory_space<vmem>>, vector<1x1x8x128xf32>
    %259 = vector.shape_cast %258 : vector<1x1x8x128xf32> to vector<8x128xf32>
    %c4_245 = arith.constant 4 : index
    %c4_246 = arith.constant 4 : index
    %c0_247 = arith.constant 0 : index
    %c0_248 = arith.constant 0 : index
    %260 = vector.load %arg3[%c4_245, %c4_246, %c0_247, %c0_248] : memref<5x5x8x128xf32, #tpu.memory_space<vmem>>, vector<1x1x8x128xf32>
    %261 = vector.shape_cast %260 : vector<1x1x8x128xf32> to vector<8x128xf32>
    %262 = vector.broadcast %2 : f32 to vector<8x128xf32>
    %263 = arith.mulf %262, %261 : vector<8x128xf32>
    %264 = arith.addf %259, %263 : vector<8x128xf32>
    %265 = arith.mulf %71, %250 : vector<8x128xf32>
    %266 = arith.addf %236, %265 : vector<8x128xf32>
    %267 = arith.mulf %73, %257 : vector<8x128xf32>
    %268 = arith.addf %266, %267 : vector<8x128xf32>
    %c2_249 = arith.constant 2 : index
    %c0_250 = arith.constant 0 : index
    %c0_251 = arith.constant 0 : index
    %c0_252 = arith.constant 0 : index
    %269 = vector.load %arg8[%c2_249, %c0_250, %c0_251, %c0_252] : memref<5x5x8x128xf32, #tpu.memory_space<vmem>>, vector<1x1x8x128xf32>
    %270 = vector.shape_cast %269 : vector<1x1x8x128xf32> to vector<8x128xf32>
    %271 = vector.shape_cast %268 : vector<8x128xf32> to vector<1x1x8x128xf32>
    tpu.vector_store %arg8[%c2_249, %c0_250, %c0_251, %c0_252], %271 {strides = array<i32>} : memref<5x5x8x128xf32, #tpu.memory_space<vmem>>, vector<1x1x8x128xf32>,
    %272 = arith.mulf %74, %250 : vector<8x128xf32>
    %273 = arith.addf %243, %272 : vector<8x128xf32>
    %274 = arith.mulf %76, %257 : vector<8x128xf32>
    %275 = arith.addf %273, %274 : vector<8x128xf32>
    %c2_253 = arith.constant 2 : index
    %c1_254 = arith.constant 1 : index
    %c0_255 = arith.constant 0 : index
    %c0_256 = arith.constant 0 : index
    %276 = vector.load %arg8[%c2_253, %c1_254, %c0_255, %c0_256] : memref<5x5x8x128xf32, #tpu.memory_space<vmem>>, vector<1x1x8x128xf32>
    %277 = vector.shape_cast %276 : vector<1x1x8x128xf32> to vector<8x128xf32>
    %278 = vector.shape_cast %275 : vector<8x128xf32> to vector<1x1x8x128xf32>
    tpu.vector_store %arg8[%c2_253, %c1_254, %c0_255, %c0_256], %278 {strides = array<i32>} : memref<5x5x8x128xf32, #tpu.memory_space<vmem>>, vector<1x1x8x128xf32>,
    %279 = vector.broadcast %2 : f32 to vector<8x128xf32>
    %280 = arith.mulf %279, %264 : vector<8x128xf32>
    %281 = arith.addf %250, %280 : vector<8x128xf32>
    %c2_257 = arith.constant 2 : index
    %c2_258 = arith.constant 2 : index
    %c0_259 = arith.constant 0 : index
    %c0_260 = arith.constant 0 : index
    %282 = vector.load %arg8[%c2_257, %c2_258, %c0_259, %c0_260] : memref<5x5x8x128xf32, #tpu.memory_space<vmem>>, vector<1x1x8x128xf32>
    %283 = vector.shape_cast %282 : vector<1x1x8x128xf32> to vector<8x128xf32>
    %284 = vector.shape_cast %281 : vector<8x128xf32> to vector<1x1x8x128xf32>
    tpu.vector_store %arg8[%c2_257, %c2_258, %c0_259, %c0_260], %284 {strides = array<i32>} : memref<5x5x8x128xf32, #tpu.memory_space<vmem>>, vector<1x1x8x128xf32>,
    %c2_261 = arith.constant 2 : index
    %c3_262 = arith.constant 3 : index
    %c0_263 = arith.constant 0 : index
    %c0_264 = arith.constant 0 : index
    %285 = vector.load %arg8[%c2_261, %c3_262, %c0_263, %c0_264] : memref<5x5x8x128xf32, #tpu.memory_space<vmem>>, vector<1x1x8x128xf32>
    %286 = vector.shape_cast %285 : vector<1x1x8x128xf32> to vector<8x128xf32>
    %287 = vector.shape_cast %77 : vector<8x128xf32> to vector<1x1x8x128xf32>
    tpu.vector_store %arg8[%c2_261, %c3_262, %c0_263, %c0_264], %287 {strides = array<i32>} : memref<5x5x8x128xf32, #tpu.memory_space<vmem>>, vector<1x1x8x128xf32>,
    %c2_265 = arith.constant 2 : index
    %c4_266 = arith.constant 4 : index
    %c0_267 = arith.constant 0 : index
    %c0_268 = arith.constant 0 : index
    %288 = vector.load %arg8[%c2_265, %c4_266, %c0_267, %c0_268] : memref<5x5x8x128xf32, #tpu.memory_space<vmem>>, vector<1x1x8x128xf32>
    %289 = vector.shape_cast %288 : vector<1x1x8x128xf32> to vector<8x128xf32>
    %290 = vector.shape_cast %77 : vector<8x128xf32> to vector<1x1x8x128xf32>
    tpu.vector_store %arg8[%c2_265, %c4_266, %c0_267, %c0_268], %290 {strides = array<i32>} : memref<5x5x8x128xf32, #tpu.memory_space<vmem>>, vector<1x1x8x128xf32>,
    %c3_269 = arith.constant 3 : index
    %c0_270 = arith.constant 0 : index
    %c0_271 = arith.constant 0 : index
    %c0_272 = arith.constant 0 : index
    %291 = vector.load %arg8[%c3_269, %c0_270, %c0_271, %c0_272] : memref<5x5x8x128xf32, #tpu.memory_space<vmem>>, vector<1x1x8x128xf32>
    %292 = vector.shape_cast %291 : vector<1x1x8x128xf32> to vector<8x128xf32>
    %293 = vector.shape_cast %77 : vector<8x128xf32> to vector<1x1x8x128xf32>
    tpu.vector_store %arg8[%c3_269, %c0_270, %c0_271, %c0_272], %293 {strides = array<i32>} : memref<5x5x8x128xf32, #tpu.memory_space<vmem>>, vector<1x1x8x128xf32>,
    %c3_273 = arith.constant 3 : index
    %c1_274 = arith.constant 1 : index
    %c0_275 = arith.constant 0 : index
    %c0_276 = arith.constant 0 : index
    %294 = vector.load %arg8[%c3_273, %c1_274, %c0_275, %c0_276] : memref<5x5x8x128xf32, #tpu.memory_space<vmem>>, vector<1x1x8x128xf32>
    %295 = vector.shape_cast %294 : vector<1x1x8x128xf32> to vector<8x128xf32>
    %296 = vector.shape_cast %77 : vector<8x128xf32> to vector<1x1x8x128xf32>
    tpu.vector_store %arg8[%c3_273, %c1_274, %c0_275, %c0_276], %296 {strides = array<i32>} : memref<5x5x8x128xf32, #tpu.memory_space<vmem>>, vector<1x1x8x128xf32>,
    %c3_277 = arith.constant 3 : index
    %c2_278 = arith.constant 2 : index
    %c0_279 = arith.constant 0 : index
    %c0_280 = arith.constant 0 : index
    %297 = vector.load %arg8[%c3_277, %c2_278, %c0_279, %c0_280] : memref<5x5x8x128xf32, #tpu.memory_space<vmem>>, vector<1x1x8x128xf32>
    %298 = vector.shape_cast %297 : vector<1x1x8x128xf32> to vector<8x128xf32>
    %299 = vector.shape_cast %77 : vector<8x128xf32> to vector<1x1x8x128xf32>
    tpu.vector_store %arg8[%c3_277, %c2_278, %c0_279, %c0_280], %299 {strides = array<i32>} : memref<5x5x8x128xf32, #tpu.memory_space<vmem>>, vector<1x1x8x128xf32>,
    %300 = vector.broadcast %5 : f32 to vector<8x128xf32>
    %301 = arith.addf %77, %300 : vector<8x128xf32>
    %c3_281 = arith.constant 3 : index
    %c3_282 = arith.constant 3 : index
    %c0_283 = arith.constant 0 : index
    %c0_284 = arith.constant 0 : index
    %302 = vector.load %arg8[%c3_281, %c3_282, %c0_283, %c0_284] : memref<5x5x8x128xf32, #tpu.memory_space<vmem>>, vector<1x1x8x128xf32>
    %303 = vector.shape_cast %302 : vector<1x1x8x128xf32> to vector<8x128xf32>
    %304 = vector.shape_cast %301 : vector<8x128xf32> to vector<1x1x8x128xf32>
    tpu.vector_store %arg8[%c3_281, %c3_282, %c0_283, %c0_284], %304 {strides = array<i32>} : memref<5x5x8x128xf32, #tpu.memory_space<vmem>>, vector<1x1x8x128xf32>,
    %c3_285 = arith.constant 3 : index
    %c4_286 = arith.constant 4 : index
    %c0_287 = arith.constant 0 : index
    %c0_288 = arith.constant 0 : index
    %305 = vector.load %arg8[%c3_285, %c4_286, %c0_287, %c0_288] : memref<5x5x8x128xf32, #tpu.memory_space<vmem>>, vector<1x1x8x128xf32>
    %306 = vector.shape_cast %305 : vector<1x1x8x128xf32> to vector<8x128xf32>
    %307 = vector.shape_cast %77 : vector<8x128xf32> to vector<1x1x8x128xf32>
    tpu.vector_store %arg8[%c3_285, %c4_286, %c0_287, %c0_288], %307 {strides = array<i32>} : memref<5x5x8x128xf32, #tpu.memory_space<vmem>>, vector<1x1x8x128xf32>,
    %c4_289 = arith.constant 4 : index
    %c0_290 = arith.constant 0 : index
    %c0_291 = arith.constant 0 : index
    %c0_292 = arith.constant 0 : index
    %308 = vector.load %arg8[%c4_289, %c0_290, %c0_291, %c0_292] : memref<5x5x8x128xf32, #tpu.memory_space<vmem>>, vector<1x1x8x128xf32>
    %309 = vector.shape_cast %308 : vector<1x1x8x128xf32> to vector<8x128xf32>
    %310 = vector.shape_cast %77 : vector<8x128xf32> to vector<1x1x8x128xf32>
    tpu.vector_store %arg8[%c4_289, %c0_290, %c0_291, %c0_292], %310 {strides = array<i32>} : memref<5x5x8x128xf32, #tpu.memory_space<vmem>>, vector<1x1x8x128xf32>,
    %c4_293 = arith.constant 4 : index
    %c1_294 = arith.constant 1 : index
    %c0_295 = arith.constant 0 : index
    %c0_296 = arith.constant 0 : index
    %311 = vector.load %arg8[%c4_293, %c1_294, %c0_295, %c0_296] : memref<5x5x8x128xf32, #tpu.memory_space<vmem>>, vector<1x1x8x128xf32>
    %312 = vector.shape_cast %311 : vector<1x1x8x128xf32> to vector<8x128xf32>
    %313 = vector.shape_cast %77 : vector<8x128xf32> to vector<1x1x8x128xf32>
    tpu.vector_store %arg8[%c4_293, %c1_294, %c0_295, %c0_296], %313 {strides = array<i32>} : memref<5x5x8x128xf32, #tpu.memory_space<vmem>>, vector<1x1x8x128xf32>,
    %c4_297 = arith.constant 4 : index
    %c2_298 = arith.constant 2 : index
    %c0_299 = arith.constant 0 : index
    %c0_300 = arith.constant 0 : index
    %314 = vector.load %arg8[%c4_297, %c2_298, %c0_299, %c0_300] : memref<5x5x8x128xf32, #tpu.memory_space<vmem>>, vector<1x1x8x128xf32>
    %315 = vector.shape_cast %314 : vector<1x1x8x128xf32> to vector<8x128xf32>
    %316 = vector.shape_cast %77 : vector<8x128xf32> to vector<1x1x8x128xf32>
    tpu.vector_store %arg8[%c4_297, %c2_298, %c0_299, %c0_300], %316 {strides = array<i32>} : memref<5x5x8x128xf32, #tpu.memory_space<vmem>>, vector<1x1x8x128xf32>,
    %c4_301 = arith.constant 4 : index
    %c3_302 = arith.constant 3 : index
    %c0_303 = arith.constant 0 : index
    %c0_304 = arith.constant 0 : index
    %317 = vector.load %arg8[%c4_301, %c3_302, %c0_303, %c0_304] : memref<5x5x8x128xf32, #tpu.memory_space<vmem>>, vector<1x1x8x128xf32>
    %318 = vector.shape_cast %317 : vector<1x1x8x128xf32> to vector<8x128xf32>
    %319 = vector.shape_cast %77 : vector<8x128xf32> to vector<1x1x8x128xf32>
    tpu.vector_store %arg8[%c4_301, %c3_302, %c0_303, %c0_304], %319 {strides = array<i32>} : memref<5x5x8x128xf32, #tpu.memory_space<vmem>>, vector<1x1x8x128xf32>,
    %320 = vector.broadcast %6 : f32 to vector<8x128xf32>
    %321 = arith.addf %77, %320 : vector<8x128xf32>
    %c4_305 = arith.constant 4 : index
    %c4_306 = arith.constant 4 : index
    %c0_307 = arith.constant 0 : index
    %c0_308 = arith.constant 0 : index
    %322 = vector.load %arg8[%c4_305, %c4_306, %c0_307, %c0_308] : memref<5x5x8x128xf32, #tpu.memory_space<vmem>>, vector<1x1x8x128xf32>
    %323 = vector.shape_cast %322 : vector<1x1x8x128xf32> to vector<8x128xf32>
    %324 = vector.shape_cast %321 : vector<8x128xf32> to vector<1x1x8x128xf32>
    tpu.vector_store %arg8[%c4_305, %c4_306, %c0_307, %c0_308], %324 {strides = array<i32>} : memref<5x5x8x128xf32, #tpu.memory_space<vmem>>, vector<1x1x8x128xf32>,
    return
  }
  func.func @transform_0(%arg0: i32, %arg1: memref<7xf32, #tpu.memory_space<smem>>) -> (i32, i32, i32) {
    %c0_i32 = arith.constant 0 : i32
    %c0_i32_0 = arith.constant 0 : i32
    %c0_i32_1 = arith.constant 0 : i32
    return %c0_i32, %arg0, %c0_i32_0 : i32, i32, i32
  }
  func.func @transform_1(%arg0: i32, %arg1: memref<7xf32, #tpu.memory_space<smem>>) -> (i32, i32, i32, i32) {
    %c0_i32 = arith.constant 0 : i32
    %c0_i32_0 = arith.constant 0 : i32
    %c0_i32_1 = arith.constant 0 : i32
    %c0_i32_2 = arith.constant 0 : i32
    return %c0_i32, %c0_i32_0, %arg0, %c0_i32_1 : i32, i32, i32, i32
  }
  func.func @transform_2(%arg0: i32, %arg1: memref<7xf32, #tpu.memory_space<smem>>) -> (i32, i32, i32) {
    %c0_i32 = arith.constant 0 : i32
    %c0_i32_0 = arith.constant 0 : i32
    %c0_i32_1 = arith.constant 0 : i32
    return %c0_i32, %arg0, %c0_i32_0 : i32, i32, i32
  }
  func.func @transform_3(%arg0: i32, %arg1: memref<7xf32, #tpu.memory_space<smem>>) -> (i32, i32, i32) {
    %c0_i32 = arith.constant 0 : i32
    %c0_i32_0 = arith.constant 0 : i32
    %c0_i32_1 = arith.constant 0 : i32
    return %c0_i32, %arg0, %c0_i32_0 : i32, i32, i32
  }
  func.func @transform_4(%arg0: i32, %arg1: memref<7xf32, #tpu.memory_space<smem>>) -> (i32, i32, i32) {
    %c0_i32 = arith.constant 0 : i32
    %c0_i32_0 = arith.constant 0 : i32
    %c0_i32_1 = arith.constant 0 : i32
    return %c0_i32, %arg0, %c0_i32_0 : i32, i32, i32
  }
  func.func @transform_5(%arg0: i32, %arg1: memref<7xf32, #tpu.memory_space<smem>>) -> (i32, i32, i32) {
    %c0_i32 = arith.constant 0 : i32
    %c0_i32_0 = arith.constant 0 : i32
    %c0_i32_1 = arith.constant 0 : i32
    return %c0_i32, %arg0, %c0_i32_0 : i32, i32, i32
  }
  func.func @transform_6(%arg0: i32, %arg1: memref<7xf32, #tpu.memory_space<smem>>) -> (i32, i32, i32, i32) {
    %c0_i32 = arith.constant 0 : i32
    %c0_i32_0 = arith.constant 0 : i32
    %c0_i32_1 = arith.constant 0 : i32
    %c0_i32_2 = arith.constant 0 : i32
    return %c0_i32, %c0_i32_0, %arg0, %c0_i32_1 : i32, i32, i32, i32
  }
}

</mosaic_0001>

<bundles_post_ra>
// kernel: tpu_custom_call.1
= control target key start
LH: loop header
LB: loop body
LE: loop exit
PB: predicated region body
PF: predicated region fallthrough
CT: control target
= control target key end

     0   :  { %s2121_s0 = inlined_call_operand.vmem [shape: f32[7], index: 0, kind: input, shape index: {}]   ;;  %s2122_s1 = inlined_call_operand.vmem [shape: f32[5,9,128], index: 1, kind: input, shape index: {}]   ;;  %s2123_s2 = inlined_call_operand.vmem [shape: f32[5,5,9,128], index: 2, kind: input, shape index: {}]   ;;  %s2124_s3 = inlined_call_operand.vmem [shape: f32[2,9,128], index: 3, kind: input, shape index: {}]   ;;  %s2125_s4 = inlined_call_operand.vmem [shape: f32[2,9,128], index: 4, kind: input, shape index: {}]   ;;  %s2126_s5 = inlined_call_operand.vmem [shape: f32[2,9,128], index: 5, kind: input, shape index: {}]   ;;  %s2127_s6 = inlined_call_operand.vmem [shape: f32[5,9,128], index: 6, kind: output, shape index: {0}]   ;;  %s2128_s7 = inlined_call_operand.vmem [shape: f32[5,5,9,128], index: 7, kind: output, shape index: {1}]  }
   0x1   :  { %s13_s26 = sshll.u32 %s2121_s0, 4  ;;  %s14_s26 = int_to_ptr.vmem [resolvable:$true] %s13_s26 }
   0x2   :  { %s1600_s27 = scalar_lea.vmem %s14_s26, 16  ;;  %p1605_p1 = scmp.lt.s32.totalorder %s14_s26, %s14_s26 }
   0x3   :  { %p1601_p0 = scmp.ne.s32.totalorder %s14_s26, %s1600_s27  ;;  %p1606_p2 = scmp.lt.s32.totalorder %s1600_s27, %s1600_s27 }
   0x5   :  { %p1607_p3 = por %p1606_p2, %p1605_p1 }
   0x7   :  { %p1608_p4 = pnand %p1607_p3, %p1601_p0 }
   0x9   :  { %1611 = shalt.err (!%p1608_p4)  }
   0xa   :  { %s1638_s28 = smov [#allocation3]  }
   0xb   :  { %16 = dma.vmem_to_smem %s14_s26, 16, %s1638_s28, [#allocation2] }
   0xc   :  { %1624 = dma.done.wait [#allocation2], 16 }
   0xd   :  { %1625 = vsyncadd [#allocation2], 4294967280 }
   0xe   :  { %18 = sfence }
   0xf   :  { %s1689_s29 = smov 0   ;;  %s1691_s30 = smov 0  }
  0x10   :  { %s1693_s8 = smov 0  }
  0x11 LB: > { %s1705_s0 = sadd.s32 4294967295, %s1636_s8   ;;  %s1708_s9 = sadd.s32 1, %s1636_s8   ;;  %s1636_s8 = sphi %s1693_s8, %s2133_s8   ;;  %s1632_s30 = sphi %s1691_s30, %s2132_s30   ;;  %s1628_s29 = sphi %s1689_s29, %s2131_s29  }
  0x12   : > { %s28_s10 = ssub.s32 %s1636_s8, %s1708_s9  ;;  %s31_s11 = sadd.s32 1, %s1632_s30 }
  0x13   : > { %p29_p5 = scmp.eq.s32.totalorder %s28_s10, 0  ;;  %p38_p6 = scmp.ne.s32.totalorder %s1632_s30, %s1628_s29 }
  0x14   : > { %p39_p7 = scmp.eq.s32.totalorder %s1636_s8, 0  ;;  %p172_p8 = scmp.eq.s32.totalorder %s1705_s0, 1 }
  0x15   : > { %s1718_s12 = scalar_select %p29_p5, %s1632_s30, %s31_s11  }
  0x16   : > { %p1720_p9 = por %p39_p7, %p38_p6  ;;  %p1724_p10 = por %p172_p8, %p38_p6 }
  0x17   : > { %p1451_p11 = scmp.ge.s32.totalorder %s1636_s8, 2 }
  0x19   : > { %220 = sbr.rel (%p1451_p11) target bundleno = 77 (0x4d), region = 16 }
  0x20   : > { %223 = sbr.rel (!%p1720_p9) target bundleno = 39 (0x27), region = 20  ;;  %s225_s15 = sand.u32 (%p1720_p9), 1, %s1632_s30  }
  0x21   : > { %s1452_s16 = sshll.u32 (%p1720_p9), %s1636_s8, 3  ;;  %s1556_s17 = smul.u32 (%p1720_p9), 40, %s225_s15 }
  0x22   : > { %s229_s20 = scalar_lea.vmem (%p1720_p9), %s2122_s1, %s1452_s16 }
  0x23   : > { %v265_v0 = vld [vmem:[%s229_s20] sm:$0xff] (%p1720_p9)  ;;  %v267_v1 = vld [vmem:[%s229_s20 + $0x10] sm:$0xff] (%p1720_p9)  ;;  %s227_s21 = scalar_lea.vmem (%p1720_p9), [#allocation4], %s1556_s17 }
  0x24   : > { %v269_v2 = vld [vmem:[%s229_s20 + $0x20] sm:$0xff] (%p1720_p9)  ;;  %v271_v3 = vld [vmem:[%s229_s20 + $0x30] sm:$0xff] (%p1720_p9)  ;;  %266 = vst [vmem:[%s227_s21] sm:$0xff] (%p1720_p9), %v265_v0  ;;  %268 = vst [vmem:[%s227_s21 + $0x8] sm:$0xff] (%p1720_p9), %v267_v1 }
  0x25   : > { %v273_v4 = vld [vmem:[%s229_s20 + $0x40] sm:$0xff] (%p1720_p9)  ;;  %270 = vst [vmem:[%s227_s21 + $0x10] sm:$0xff] (%p1720_p9), %v269_v2  ;;  %272 = vst [vmem:[%s227_s21 + $0x18] sm:$0xff] (%p1720_p9), %v271_v3 }
  0x26   : > { %274 = vst [vmem:[%s227_s21 + $0x20] sm:$0xff] (%p1720_p9), %v273_v4 }
  0x27 PF: > { %280 = sbr.rel (!%p1720_p9) target bundleno = 56 (0x38), region = 58  ;;  %s282_s22 = sand.u32 (%p1720_p9), 1, %s1632_s30  }
  0x28   : > { %s1453_s23 = sshll.u32 (%p1720_p9), %s1636_s8, 3  ;;  %s1557_s24 = smul.u32 (%p1720_p9), 200, %s282_s22 }
  0x29   : > { %s1743_s27 = scalar_lea.vmem (%p1720_p9), %s2123_s2, %s1453_s23 }
  0x2a   : > { %v362_v5 = vld [vmem:[%s1743_s27] sm:$0xff] (%p1720_p9)  ;;  %v364_v6 = vld [vmem:[%s1743_s27 + $0x10] sm:$0xff] (%p1720_p9)  ;;  %s1751_s28 = scalar_lea.vmem (%p1720_p9), [#allocation5], %s1557_s24 }
  0x2b   : > { %v366_v7 = vld [vmem:[%s1743_s27 + $0x20] sm:$0xff] (%p1720_p9)  ;;  %v368_v8 = vld [vmem:[%s1743_s27 + $0x30] sm:$0xff] (%p1720_p9)  ;;  %363 = vst [vmem:[%s1751_s28] sm:$0xff] (%p1720_p9), %v362_v5  ;;  %365 = vst [vmem:[%s1751_s28 + $0x8] sm:$0xff] (%p1720_p9), %v364_v6 }
  0x2c   : > { %v370_v9 = vld [vmem:[%s1743_s27 + $0x40] sm:$0xff] (%p1720_p9)  ;;  %v372_v10 = vld [vmem:[%s1743_s27 + $0x50] sm:$0xff] (%p1720_p9)  ;;  %367 = vst [vmem:[%s1751_s28 + $0x10] sm:$0xff] (%p1720_p9), %v366_v7  ;;  %369 = vst [vmem:[%s1751_s28 + $0x18] sm:$0xff] (%p1720_p9), %v368_v8 }
  0x2d   : > { %371 = vst [vmem:[%s1751_s28 + $0x20] sm:$0xff] (%p1720_p9), %v370_v9  ;;  %373 = vst [vmem:[%s1751_s28 + $0x28] sm:$0xff] (%p1720_p9), %v372_v10  ;;  %v374_v11 = vld [vmem:[%s1743_s27 + $0x60] sm:$0xff] (%p1720_p9)  ;;  %v376_v12 = vld [vmem:[%s1743_s27 + $0x70] sm:$0xff] (%p1720_p9) }
  0x2e   : > { %v378_v13 = vld [vmem:[%s1743_s27 + $0x80] sm:$0xff]  ;;  %375 = vst [vmem:[%s1751_s28 + $0x30] sm:$0xff] %v374_v11  ;;  %377 = vst [vmem:[%s1751_s28 + $0x38] sm:$0xff] %v376_v12  ;;  %v380_v14 = vld [vmem:[%s1743_s27 + $0x90] sm:$0xff] }
  0x2f   : > { %379 = vst [vmem:[%s1751_s28 + $0x40] sm:$0xff] %v378_v13  ;;  %v382_v15 = vld [vmem:[%s1743_s27 + $0xa0] sm:$0xff]  ;;  %v384_v16 = vld [vmem:[%s1743_s27 + $0xb0] sm:$0xff]  ;;  %381 = vst [vmem:[%s1751_s28 + $0x48] sm:$0xff] %v380_v14 }
  0x30   : > { %383 = vst [vmem:[%s1751_s28 + $0x50] sm:$0xff] %v382_v15  ;;  %385 = vst [vmem:[%s1751_s28 + $0x58] sm:$0xff] %v384_v16  ;;  %v386_v17 = vld [vmem:[%s1743_s27 + $0xc0] sm:$0xff]  ;;  %v388_v18 = vld [vmem:[%s1743_s27 + $0xd0] sm:$0xff] }
  0x31   : > { %v390_v19 = vld [vmem:[%s1743_s27 + $0xe0] sm:$0xff]  ;;  %387 = vst [vmem:[%s1751_s28 + $0x60] sm:$0xff] %v386_v17  ;;  %389 = vst [vmem:[%s1751_s28 + $0x68] sm:$0xff] %v388_v18  ;;  %v392_v20 = vld [vmem:[%s1743_s27 + $0xf0] sm:$0xff] }
  0x32   : > { %391 = vst [vmem:[%s1751_s28 + $0x70] sm:$0xff] %v390_v19  ;;  %v394_v21 = vld [vmem:[%s1743_s27 + $0x100] sm:$0xff]  ;;  %v396_v22 = vld [vmem:[%s1743_s27 + $0x110] sm:$0xff]  ;;  %393 = vst [vmem:[%s1751_s28 + $0x78] sm:$0xff] %v392_v20 }
  0x33   : > { %395 = vst [vmem:[%s1751_s28 + $0x80] sm:$0xff] %v394_v21  ;;  %397 = vst [vmem:[%s1751_s28 + $0x88] sm:$0xff] %v396_v22  ;;  %v398_v23 = vld [vmem:[%s1743_s27 + $0x120] sm:$0xff]  ;;  %v400_v24 = vld [vmem:[%s1743_s27 + $0x130] sm:$0xff] }
  0x34   : > { %v402_v25 = vld [vmem:[%s1743_s27 + $0x140] sm:$0xff]  ;;  %399 = vst [vmem:[%s1751_s28 + $0x90] sm:$0xff] %v398_v23  ;;  %401 = vst [vmem:[%s1751_s28 + $0x98] sm:$0xff] %v400_v24  ;;  %v404_v26 = vld [vmem:[%s1743_s27 + $0x150] sm:$0xff] }
  0x35   : > { %403 = vst [vmem:[%s1751_s28 + $0xa0] sm:$0xff] %v402_v25  ;;  %v406_v27 = vld [vmem:[%s1743_s27 + $0x160] sm:$0xff]  ;;  %v408_v28 = vld [vmem:[%s1743_s27 + $0x170] sm:$0xff]  ;;  %405 = vst [vmem:[%s1751_s28 + $0xa8] sm:$0xff] %v404_v26 }
  0x36   : > { %407 = vst [vmem:[%s1751_s28 + $0xb0] sm:$0xff] %v406_v27  ;;  %409 = vst [vmem:[%s1751_s28 + $0xb8] sm:$0xff] %v408_v28  ;;  %v410_v29 = vld [vmem:[%s1743_s27 + $0x180] sm:$0xff] }
  0x37   : > { %411 = vst [vmem:[%s1751_s28 + $0xc0] sm:$0xff] %v410_v29 }
  0x38 PF: > { %417 = sbr.rel (!%p1720_p9) target bundleno = 63 (0x3f), region = 96  ;;  %s419_s10 = sand.u32 (%p1720_p9), 1, %s1632_s30  }
  0x39   : > { %s1455_s11 = sshll.u32 (%p1720_p9), %s1636_s8, 3  ;;  %s1454_s15 = sshll.u32 (%p1720_p9), %s419_s10, 4 }
  0x3a   : > { %s423_s18 = scalar_lea.vmem (%p1720_p9), %s2124_s3, %s1455_s11  ;;  %s421_s19 = scalar_lea.vmem (%p1720_p9), [#allocation6], %s1454_s15 }
  0x3b   : > { %v453_v30 = vld [vmem:[%s423_s18] sm:$0xff] (%p1720_p9)  ;;  %v455_v31 = vld [vmem:[%s423_s18 + $0x10] sm:$0xff] (%p1720_p9) }
  0x3c   : > { %454 = vst [vmem:[%s421_s19] sm:$0xff] (%p1720_p9), %v453_v30  ;;  %456 = vst [vmem:[%s421_s19 + $0x8] sm:$0xff] (%p1720_p9), %v455_v31 }
  0x3f PF: > { %462 = sbr.rel (!%p1720_p9) target bundleno = 70 (0x46), region = 134  ;;  %s464_s20 = sand.u32 (%p1720_p9), 1, %s1632_s30  }
  0x40   : > { %s1457_s21 = sshll.u32 (%p1720_p9), %s1636_s8, 3  ;;  %s1456_s22 = sshll.u32 (%p1720_p9), %s464_s20, 4 }
  0x41   : > { %s468_s25 = scalar_lea.vmem (%p1720_p9), %s2125_s4, %s1457_s21  ;;  %s466_s26 = scalar_lea.vmem (%p1720_p9), [#allocation7], %s1456_s22 }
  0x42   : > { %v498_v32 = vld [vmem:[%s468_s25] sm:$0xff] (%p1720_p9)  ;;  %v500_v33 = vld [vmem:[%s468_s25 + $0x10] sm:$0xff] (%p1720_p9) }
  0x43   : > { %499 = vst [vmem:[%s466_s26] sm:$0xff] (%p1720_p9), %v498_v32  ;;  %501 = vst [vmem:[%s466_s26 + $0x8] sm:$0xff] (%p1720_p9), %v500_v33 }
  0x46 PF: > { %507 = sbr.rel (!%p1720_p9) target bundleno = 77 (0x4d), region = 172  ;;  %s509_s27 = sand.u32 (%p1720_p9), 1, %s1632_s30  }
  0x47   : > { %s1459_s28 = sshll.u32 (%p1720_p9), %s1636_s8, 3  ;;  %s1458_s10 = sshll.u32 (%p1720_p9), %s509_s27, 4 }
  0x48   : > { %s513_s16 = scalar_lea.vmem (%p1720_p9), %s2126_s5, %s1459_s28  ;;  %s511_s17 = scalar_lea.vmem (%p1720_p9), [#allocation8], %s1458_s10 }
  0x49   : > { %v543_v34 = vld [vmem:[%s513_s16] sm:$0xff] (%p1720_p9)  ;;  %v545_v35 = vld [vmem:[%s513_s16 + $0x10] sm:$0xff] (%p1720_p9) }
  0x4a   : > { %544 = vst [vmem:[%s511_s17] sm:$0xff] (%p1720_p9), %v543_v34  ;;  %546 = vst [vmem:[%s511_s17 + $0x8] sm:$0xff] (%p1720_p9), %v545_v35 }
  0x4d PF: > { %p1460_p12 = scmp.ge.s32.totalorder %s1636_s8, 1  ;;  %p551_p13 = scmp.lt.s32.totalorder %s1636_s8, 3 }
  0x4f   : > { %p552_p0 = pnand %p1460_p12, %p551_p13 }
  0x50   : > { %s1821_s13 = sand.u32 (!%p552_p0), 1, %s1628_s29   ;;  %s1465_s18 = sld [smem:[#allocation3 + $0x2]] (!%p552_p0)  ;;  %v1639_v40 = vmov (!%p552_p0), 0.0   ;;  %v1640_v60 = vmov (!%p552_p0), 683565275  }
  0x51   : > { %555 = sbr.rel (%p552_p0) target bundleno = 205 (0xcd), region = 210  ;;  %s1856_s8 = sshll.u32 (!%p552_p0), %s1821_s13, 4  ;;  %v1641_v62 = vmov (!%p552_p0), 2475754826   ;;  %v1642_v0 = vmov (!%p552_p0), 2131351028  }
  0x52   : > { %s1558_s19 = smul.u32 (!%p552_p0), 40, %s1821_s13  ;;  %s634_s22 = sld [smem:[#allocation3]] (!%p552_p0)  ;;  %v1643_v2 = vmov (!%p552_p0), 2102212464   ;;  %v1644_v4 = vmov (!%p552_p0), 920167782  }
  0x53   : > { %s1559_s20 = smul.u32 (!%p552_p0), 200, %s1821_s13  ;;  %s1861_s23 = sld [smem:[#allocation3 + $0x3]] (!%p552_p0)  ;;  %v1645_v14 = vmov (!%p552_p0), 1326507024  }
  0x54   : > { %s1827_s21 = scalar_lea.vmem (!%p552_p0), [#allocation4], %s1558_s19  ;;  %s1863_s24 = sld [smem:[#allocation3 + $0x1]] (!%p552_p0) }
  0x55   : > { %v1830_v36 = vld [vmem:[%s1827_s21 + $0x10] sm:$0xff] (!%p552_p0)  ;;  %v1473_v39 = vld [vmem:[%s1827_s21 + $0x20] sm:$0xff] (!%p552_p0)  ;;  %s1837_s29 = scalar_lea.vmem (!%p552_p0), [#allocation10], %s1559_s20  ;;  %s1868_s25 = scalar_lea.vmem (!%p552_p0), [#allocation9], %s1558_s19 }
  0x56   : > { %v650_v37 = vand.u32 (!%p552_p0), 2147483647, %v1830_v36  ;;  %v653_v38 = vand.u32 (!%p552_p0), 2139095040, %v1830_v36  ;;  %1505 = vst [vmem:[%s1837_s29 + $0x18] sm:$0xff] (!%p552_p0), %v1639_v40  ;;  %1506 = vst [vmem:[%s1837_s29 + $0x20] sm:$0xff] (!%p552_p0), %v1639_v40  ;;  %v1853_v42 = vstv (!%p552_p0), %s1465_s18  ;;  %s581_s26 = scalar_lea.vmem (!%p552_p0), [#allocation7], %s1856_s8  ;;  %vm742_vm13 = vweird.f32 (!%p552_p0), %v1830_v36 }
  0x57   : > { %1525 = vst [vmem:[%s1837_s29 + $0x40] sm:$0xff] (!%p552_p0), %v1639_v40  ;;  %1526 = vst [vmem:[%s1837_s29 + $0x48] sm:$0xff] (!%p552_p0), %v1639_v40  ;;  %v866_v44 = vmul.f32 (!%p552_p0), %v1473_v39, %v1853_v42  ;;  %v870_v49 = vld [vmem:[%s581_s26] sm:$0xff] (!%p552_p0)  ;;  %v1484_v54 = vld [vmem:[%s581_s26 + $0x8] sm:$0xff] (!%p552_p0)  ;;  %s1876_s27 = sld [smem:[#allocation3 + $0x4]] (!%p552_p0)  ;;  %s588_s28 = scalar_lea.vmem (!%p552_p0), [#allocation8], %s1856_s8 }
  0x58   : > { %1540 = vst [vmem:[%s1837_s29 + $0x68] sm:$0xff] %v1639_v40  ;;  %1541 = vst [vmem:[%s1837_s29 + $0x70] sm:$0xff] %v1639_v40  ;;  %v654_v41 = vshrl.u32 %v653_v38, 23  ;;  %v657_v43 = vand.u32 8388607, %v650_v37  ;;  %v871_v51 = vstv %s634_s22  ;;  %v873_v6 = vld [vmem:[%s588_s28] sm:$0xff] }
  0x59   : > { %1542 = vst [vmem:[%s1837_s29 + $0x78] sm:$0xff] %v1639_v40  ;;  %1543 = vst [vmem:[%s1837_s29 + $0x80] sm:$0xff] %v1639_v40  ;;  %v867_v46 = vadd.f32 %v1830_v36, %v866_v44  ;;  %v872_v57 = vmul.f32 %v871_v51, %v870_v49  ;;  %v884_v58 = vstv %s1861_s23  ;;  %v1485_v12 = vld [vmem:[%s588_s28 + $0x8] sm:$0xff]  ;;  %s574_s10 = scalar_lea.vmem [#allocation6], %s1856_s8  ;;  %s1880_s11 = sld [smem:[#allocation3 + $0x5]]  ;;  %vm652_vm7 = vcmp.lt.s32.totalorder %v1830_v36, 0 }
  0x5a   : > { %1544 = vst [vmem:[%s1837_s29 + $0x88] sm:$0xff] %v1639_v40  ;;  %1546 = vst [vmem:[%s1837_s29 + $0x98] sm:$0xff] %v1639_v40  ;;  %v1474_v45 = vadd.s32 4294967169, %v654_v41  ;;  %v658_v48 = vor.u32 8388608, %v657_v43  ;;  %v877_v55 = vstv %s1863_s24  ;;  %v882_v20 = vld [vmem:[%s574_s10] sm:$0xff]  ;;  %s1882_s15 = sld [smem:[#allocation3 + $0x6]] }
  0x5b   : > { %1547 = vst [vmem:[%s1837_s29 + $0xa0] sm:$0xff] %v1639_v40  ;;  %1548 = vst [vmem:[%s1837_s29 + $0xa8] sm:$0xff] %v1639_v40  ;;  %v878_v7 = vmul.f32 %v1484_v54, %v877_v55  ;;  %v874_v19 = vadd.f32 %v873_v6, %v872_v57  ;;  %v1487_v24 = vld [vmem:[%s574_s10 + $0x8] sm:$0xff]  ;;  %s1896_s16 = scalar_lea.vmem [#allocation5], %s1559_s20  ;;  %vm651_vm8 = vcmp.le.f32.partialorder %v650_v37, 0.7853982 }
  0x5c   : > { %1549 = vst [vmem:[%s1837_s29 + $0xb0] sm:$0xff] %v1639_v40  ;;  %1550 = vst [vmem:[%s1837_s29 + $0xb8] sm:$0xff] %v1639_v40  ;;  %v660_v47 = vadd.s32 1, %v1474_v45  ;;  %v1873_v56 = vshll.u32 %v658_v48, 8  ;;  %v1536_v44 = vld [vmem:[%s1896_s16 + $0xc0] sm:$0xff]  ;;  %v1532_v49 = vld [vmem:[%s1896_s16 + $0xb0] sm:$0xff] }
  0x5d   : > { %1483 = vst [vmem:[%s1868_s25 + $0x10] sm:$0xff] %v867_v46  ;;  %v881_v23 = vadd.f32 %v1485_v12, %v878_v7  ;;  %v883_v32 = vsub.f32 %v882_v20, %v874_v19  ;;  %v892_v38 = vstv %s1876_s27  ;;  %v1042_v57 = vmul.f32 %v1532_v49, %v1853_v42  ;;  %v1528_v37 = vld [vmem:[%s1896_s16 + $0xa0] sm:$0xff]  ;;  %s1552_s17 = sshll.u32 (%p1724_p10), %s1705_s0, 3 }
  0x5e   : > { %vm661_vm0 = vcmp.gt.s32.totalorder %v660_v47, 0  ;;  %s1110_s19 = scalar_lea.vmem (%p1724_p10), %s2127_s6, %s1552_s17 }
  0x5f   : > { %v662_v50 = vsel %vm661_vm0, %v660_v47, 0  ;;  %v891_v35 = vsub.f32 %v1487_v24, %v881_v23  ;;  %v885_v43 = vmul.f32 %v884_v58, %v883_v32 }
  0x60   : > { %v663_v52 = vshrl.u32 %v662_v50, 5  ;;  %v664_v53 = vand.u32 31, %v662_v50  ;;  %v1094_v58 = vstv %s1882_s15 }
  0x61   : > { %v886_v50 = vadd.f32 %v885_v43, %v874_v19  ;;  %v893_v51 = vmul.f32 %v892_v38, %v891_v35  ;;  %1551 = vst [vmem:[%s1837_s29 + $0xc0] sm:$0xff] %v1094_v58 }
  0x62   : > { %v665_v59 = vsub.s32 32, %v664_v53  ;;  %v667_v61 = vshll.u32 %v1640_v60, %v664_v53  ;;  %v670_v63 = vshll.u32 %v1641_v62, %v664_v53  ;;  %v673_v1 = vshll.u32 %v1642_v0, %v664_v53 }
  0x63   : > { %v676_v3 = vshll.u32 %v1643_v2, %v664_v53  ;;  %v679_v5 = vshll.u32 %v1644_v4, %v664_v53  ;;  %vm682_vm1 = vcmp.lt.s32.totalorder %v663_v52, 1  ;;  %vm683_vm2 = vcmp.lt.s32.totalorder %v663_v52, 2  ;;  %1486 = vst [vmem:[%s1868_s25 + $0x18] sm:$0xff] %v886_v50 }
  0x64   : > { %v666_v8 = vshrl.u32 %v1640_v60, %v665_v59  ;;  %v668_v9 = vshrl.u32 %v1641_v62, %v665_v59  ;;  %v671_v10 = vshrl.u32 %v1642_v0, %v665_v59  ;;  %v674_v11 = vshrl.u32 %v1643_v2, %v665_v59  ;;  %v1918_v60 = vld [vmem:[%s1896_s16 + $0x70] sm:$0xff] }
  0x65   : > { %v677_v13 = vshrl.u32 %v1644_v4, %v665_v59  ;;  %v680_v15 = vshrl.u32 %v1645_v14, %v665_v59  ;;  %vm685_vm3 = vcmp.lt.s32.totalorder %v663_v52, 4  ;;  %vm684_vm4 = vcmp.lt.s32.totalorder %v663_v52, 3 }
  0x66   : > { %v669_v16 = vor.u32 %v668_v9, %v667_v61  ;;  %v672_v17 = vor.u32 %v671_v10, %v670_v63  ;;  %v675_v18 = vor.u32 %v674_v11, %v673_v1  ;;  %v1052_v52 = vmul.f32 %v1536_v44, %v1853_v42 }
  0x67   : > { %v678_v21 = vor.u32 %v677_v13, %v676_v3  ;;  %v681_v22 = vor.u32 %v680_v15, %v679_v5  ;;  %v1080_v53 = vstv %s1880_s11  ;;  %v894_v55 = vadd.f32 %v893_v51, %v881_v23 }
  0x68   : > { %v686_v25 = vsel %vm682_vm1, %v666_v8, %v669_v16  ;;  %v687_v26 = vsel %vm685_vm3, %v675_v18, 2102212464  ;;  %v690_v27 = vsel %vm682_vm1, %v669_v16, %v672_v17  ;;  %v694_v28 = vsel %vm682_vm1, %v672_v17, %v675_v18  ;;  %1545 = vst [vmem:[%s1837_s29 + $0x90] sm:$0xff] %v1080_v53 }
  0x69   : > { %v688_v29 = vsel %vm684_vm4, %v672_v17, %v687_v26  ;;  %v691_v30 = vsel %vm685_vm3, %v678_v21, 920167782  ;;  %v695_v31 = vsel %vm685_vm3, %v681_v22, 1326507024  ;;  %1488 = vst [vmem:[%s1868_s25 + $0x20] sm:$0xff] %v894_v55  ;;  %v1053_v61 = vadd.f32 %v1918_v60, %v1052_v52  ;;  %v641_v52 = vld [vmem:[%s1827_s21] sm:$0xff] }
  0x6a   : > { %v692_v33 = vsel %vm684_vm4, %v675_v18, %v691_v30  ;;  %v696_v34 = vsel %vm684_vm4, %v678_v21, %v695_v31  ;;  %v689_v39 = vsel %vm683_vm2, %v686_v25, %v688_v29  ;;  %v1472_v31 = vld [vmem:[%s1827_s21 + $0x18] sm:$0xff] }
  0x6b   : > { %v693_v40 = vsel %vm683_vm2, %v690_v27, %v692_v33  ;;  %v697_v41 = vsel %vm683_vm2, %v694_v28, %v696_v34  ;;  %v705_v54 = vmul.u32 %v1873_v56, %v689_v39  ;;  %v1066_v1 = vmul.f32 %v1053_v61, %v1853_v42  ;;  %v1490_v61 = vld [vmem:[%s1896_s16 + $0x78] sm:$0xff] }
  0x6c   : > { %v1900_v45 = vmul.u32.u64.low %v1873_v56, %v697_v41  ;;  %v1901_v46 = vmul.u32.u64.high %v1873_v56, %v697_v41, %v1900_v45  ;;  %v1904_v47 = vmul.u32.u64.low %v1873_v56, %v693_v40  ;;  %v1905_v48 = vmul.u32.u64.high %v1873_v56, %v693_v40, %v1904_v47  ;;  %v1925_v56 = vld [vmem:[%s1896_s16 + $0x60] sm:$0xff]  ;;  %v1534_v40 = vld [vmem:[%s1896_s16 + $0xb8] sm:$0xff]  ;;  %v1530_v41 = vld [vmem:[%s1896_s16 + $0xa8] sm:$0xff] }
  0x6d   : > { %v1928_v0 = vadd.f32 %v1925_v56, %v1042_v57  ;;  %v858_v34 = vmul.f32 %v1472_v31, %v1853_v42  ;;  %v1047_v50 = vmul.f32 %v1534_v40, %v1853_v42  ;;  %v1037_v51 = vmul.f32 %v1530_v41, %v1853_v42 }
  0x6e   : > { %vm707_vm5 = vc.u32 %v1901_v46, %v1904_v47  ;;  %v708_v59 = vadd.s32 1, %v1905_v48  ;;  %v706_v11 = vadd.s32 %v1904_v47, %v1901_v46  ;;  %v1032_v47 = vmul.f32 %v1528_v37, %v1853_v42 }
  0x6f   : > { %v1067_v3 = vadd.f32 %v1066_v1, %v1928_v0  ;;  %v897_v46 = vsub.f32 0.0, %v858_v34 }
  0x70   : > { %v709_v62 = vsel %vm707_vm5, %v708_v59, %v1905_v48  ;;  %v1489_v59 = vld [vmem:[%s1896_s16 + $0x50] sm:$0xff] }
  0x71   : > { %v710_v63 = vadd.s32 %v709_v62, %v705_v54  ;;  %1539 = vst [vmem:[%s1837_s29 + $0x60] sm:$0xff] %v1067_v3  ;;  %v1470_v54 = vld [vmem:[%s1827_s21 + $0x8] sm:$0xff]  ;;  %v1496_v62 = vld [vmem:[%s1896_s16 + $0x88] sm:$0xff] }
  0x73   : > { %v711_v2 = vadd.s32 536870912, %v710_v63 }
  0x75   : > { %v712_v4 = vshrl.u32 %v711_v2, 30 }
  0x77   : > { %v713_v5 = vshll.u32 %v712_v4, 30  ;;  %v736_v23 = vsub.s32 4, %v712_v4 }
  0x79   : > { %v714_v6 = vsub.s32 %v710_v63, %v713_v5  ;;  %v737_v26 = vsel %vm652_vm7, %v736_v23, %v712_v4  ;;  %v1498_v4 = vld [vmem:[%s1896_s16 + $0x68] sm:$0xff]  ;;  %v1499_v5 = vld [vmem:[%s1896_s16 + $0x90] sm:$0xff] }
  0x7a   : > { %v739_v29 = vsel %vm651_vm8, 0, %v737_v26  ;;  %v1491_v23 = vld [vmem:[%s1896_s16 + $0x8] sm:$0xff] }
  0x7b   : > { %v716_v7 = vsub.s32 0, %v714_v6  ;;  %v846_v30 = vadd.s32 3, %v739_v29  ;;  %v743_v32 = vand.u32 3, %v739_v29  ;;  %v1507_v29 = vld [vmem:[%s1896_s16 + $0x28] sm:$0xff] }
  0x7d   : > { %v1475_v8 = vmin.u32 %v716_v7, %v714_v6  ;;  %v847_v33 = vand.u32 3, %v846_v30  ;;  %vm748_vm9 = vcmp.eq.s32.totalorder %v743_v32, 2  ;;  %vm745_vm11 = vcmp.eq.s32.totalorder %v743_v32, 0  ;;  %v901_v7 = vld [vmem:[%s1896_s16] sm:$0xff] }
  0x7e   : > { %vm744_vm14 = vcmp.lt.s32.totalorder %v743_v32, 2 }
  0x7f   : > { %v718_v9 = vclz %v1475_v8  ;;  %vm852_vm10 = vcmp.eq.s32.totalorder %v847_v33, 2  ;;  %vm849_vm12 = vcmp.eq.s32.totalorder %v847_v33, 0  ;;  %vm848_vm15 = vcmp.lt.s32.totalorder %v847_v33, 2  ;;  %v1493_v8 = vld [vmem:[%s1896_s16 + $0x80] sm:$0xff] }
  0x81   : > { %v1476_v10 = vadd.s32 4294967294, %v718_v9  ;;  %v1971_v9 = vadd.f32 %v1489_v59, %v1032_v47 }
  0x83   : > { %vm1477_vm6 = vcmp.lt.s32.totalorder %v1476_v10, 0 }
  0x84   : > { %v721_v12 = vsel %vm1477_vm6, 0, %v1476_v10  ;;  %v1973_v10 = vadd.f32 %v1498_v4, %v1047_v50 }
  0x85   : > { %v722_v13 = vsub.s32 32, %v721_v12  ;;  %v723_v14 = vshll.u32 %v714_v6, %v721_v12  ;;  %v726_v15 = vsub.s32 4294967266, %v721_v12  ;;  %v1492_v6 = vld [vmem:[%s1896_s16 + $0x58] sm:$0xff] }
  0x87   : > { %v724_v16 = vshrl.u32 %v706_v11, %v722_v13  ;;  %v727_v17 = vadd.s32 127, %v726_v15  ;;  %v1975_v11 = vadd.f32 %v1492_v6, %v1037_v51 }
  0x89   : > { %v725_v18 = vor.u32 %v724_v16, %v723_v14  ;;  %v728_v19 = vshll.u32 %v727_v17, 23  ;;  %v1494_v16 = vld [vmem:[%s1896_s16 + $0x10] sm:$0xff]  ;;  %v1497_v17 = vld [vmem:[%s1896_s16 + $0x18] sm:$0xff] }
  0x8b   : > { %v729_v20 = vor.u32 4788187, %v728_v19  ;;  %v732_v21 = vcvt.s32.f32 %v725_v18  ;;  %v1502_v18 = vld [vmem:[%s1896_s16 + $0x98] sm:$0xff] }
  0x8d   : > { %v730_v22 = vand.u32 2147483647, %v729_v20 }
  0x8f   : > { %v733_v24 = vmul.f32 %v732_v21, %v730_v22 }
  0x91   : > { %v734_v25 = vxor.u32 2147483648, %v733_v24 }
  0x93   : > { %v735_v27 = vsel %vm652_vm7, %v734_v25, %v733_v24  ;;  %v1500_v24 = vld [vmem:[%s1896_s16 + $0x20] sm:$0xff] }
  0x94   : > { %v738_v28 = vsel %vm651_vm8, %v1830_v36, %v735_v27 }
  0x95   : > { %1596 = vcosq.f32 %v738_v28 }
  0x96   : > { %1598 = vsinq.f32 %v738_v28 }
  0x9f   : > { %v1597_v35 = vpop.eup %1596 }
  0xa0   : > { %v1599_v38 = vpop.eup %1598  ;;  %v749_v39 = vxor.u32 2147483648, %v1597_v35 }
  0xa1   : > { %v746_v43 = vxor.u32 2147483648, %v1599_v38 }
  0xa2   : > { %v750_v44 = vsel %vm748_vm9, %v749_v39, %v1599_v38  ;;  %v854_v45 = vsel %vm852_vm10, %v749_v39, %v1599_v38 }
  0xa3   : > { %v747_v48 = vsel %vm745_vm11, %v1597_v35, %v746_v43  ;;  %v851_v49 = vsel %vm849_vm12, %v1597_v35, %v746_v43  ;;  %v1513_v43 = vld [vmem:[%s1896_s16 + $0x38] sm:$0xff] }
  0xa4   : > { %v751_v53 = vsel %vm744_vm14, %v747_v48, %v750_v44  ;;  %v855_v55 = vsel %vm848_vm15, %v851_v49, %v854_v45  ;;  %v1516_v45 = vld [vmem:[%s1896_s16 + $0x40] sm:$0xff] }
  0xa5   : > { %v752_v57 = vsel %vm742_vm13, nan, %v751_v53  ;;  %v856_v58 = vsel %vm742_vm13, nan, %v855_v55 }
  0xa6   : > { %v1956_v63 = vmul.f32 %v858_v34, %v752_v57  ;;  %v1959_v1 = vmul.f32 %v1853_v42, %v752_v57  ;;  %v862_v2 = vmul.f32 %v858_v34, %v856_v58  ;;  %v1961_v3 = vmul.f32 %v897_v46, %v856_v58 }
  0xa7   : > { %v1967_v36 = vmul.f32 %v1853_v42, %v856_v58  ;;  %v1510_v58 = vld [vmem:[%s1896_s16 + $0x30] sm:$0xff] }
  0xa8   : > { %v860_v12 = vadd.f32 %v1956_v63, %v641_v52  ;;  %v863_v13 = vadd.f32 %v1470_v54, %v862_v2  ;;  %v904_v14 = vmul.f32 %v1489_v59, %v1961_v3  ;;  %v908_v15 = vmul.f32 %v1490_v61, %v1959_v1 }
  0xa9   : > { %v924_v19 = vmul.f32 %v1925_v56, %v1961_v3  ;;  %v928_v20 = vmul.f32 %v1496_v62, %v1959_v1  ;;  %v934_v21 = vmul.f32 %v1498_v4, %v1961_v3  ;;  %v938_v22 = vmul.f32 %v1499_v5, %v1959_v1 }
  0xaa   : > { %861 = vst [vmem:[%s1868_s25] sm:$0xff] %v860_v12  ;;  %1482 = vst [vmem:[%s1868_s25 + $0x8] sm:$0xff] %v863_v13  ;;  %v905_v25 = vadd.f32 %v904_v14, %v901_v7  ;;  %v914_v26 = vmul.f32 %v1492_v6, %v1961_v3  ;;  %v918_v27 = vmul.f32 %v1493_v8, %v1959_v1 }
  0xab   : > { %v944_v28 = vmul.f32 %v1918_v60, %v1961_v3  ;;  %v925_v30 = vadd.f32 %v1494_v16, %v924_v19  ;;  %v935_v31 = vadd.f32 %v1497_v17, %v934_v21  ;;  %v948_v32 = vmul.f32 %v1502_v18, %v1959_v1 }
  0xac   : > { %v972_v33 = vmul.f32 %v1489_v59, %v1956_v63  ;;  %v909_v34 = vadd.f32 %v908_v15, %v905_v25  ;;  %v915_v35 = vadd.f32 %v1491_v23, %v914_v26  ;;  %v975_v38 = vmul.f32 %v1490_v61, %v1967_v36 }
  0xad   : > { %v945_v37 = vadd.f32 %v1500_v24, %v944_v28  ;;  %v929_v39 = vadd.f32 %v928_v20, %v925_v30  ;;  %v939_v40 = vadd.f32 %v938_v22, %v935_v31  ;;  %v988_v44 = vmul.f32 %v1925_v56, %v1956_v63 }
  0xae   : > { %v973_v41 = vadd.f32 %v1507_v29, %v972_v33  ;;  %v919_v46 = vadd.f32 %v918_v27, %v915_v35  ;;  %v991_v48 = vmul.f32 %v1496_v62, %v1967_v36  ;;  %v996_v49 = vmul.f32 %v1498_v4, %v1956_v63  ;;  %v1519_v4 = vld [vmem:[%s1896_s16 + $0x48] sm:$0xff] }
  0xaf   : > { %v949_v47 = vadd.f32 %v948_v32, %v945_v37  ;;  %v950_v50 = vmul.f32 %v929_v39, %v1961_v3  ;;  %v952_v51 = vmul.f32 %v939_v40, %v1959_v1  ;;  %v955_v52 = vmul.f32 %v929_v39, %v1956_v63 }
  0xb0   : > { %v957_v53 = vmul.f32 %v939_v40, %v1967_v36  ;;  %v976_v55 = vadd.f32 %v975_v38, %v973_v41  ;;  %v989_v56 = vadd.f32 %v1513_v43, %v988_v44  ;;  %v997_v57 = vadd.f32 %v1516_v45, %v996_v49 }
  0xb1   : > { %v961_v54 = vmul.f32 %v949_v47, %v1853_v42  ;;  %v951_v59 = vadd.f32 %v950_v50, %v909_v34  ;;  %v956_v61 = vadd.f32 %v955_v52, %v919_v46  ;;  %v999_v62 = vmul.f32 %v1499_v5, %v1967_v36 }
  0xb2   : > { %v980_v2 = vmul.f32 %v1492_v6, %v1956_v63  ;;  %v992_v12 = vadd.f32 %v991_v48, %v989_v56  ;;  %v983_v13 = vmul.f32 %v1493_v8, %v1967_v36  ;;  %v1004_v14 = vmul.f32 %v1918_v60, %v1956_v63 }
  0xb3   : > { %v962_v7 = vadd.f32 %v961_v54, %v929_v39  ;;  %v953_v15 = vadd.f32 %v952_v51, %v951_v59  ;;  %v958_v16 = vadd.f32 %v957_v53, %v956_v61  ;;  %v1000_v17 = vadd.f32 %v999_v62, %v997_v57 }
  0xb4   : > { %v981_v19 = vadd.f32 %v1510_v58, %v980_v2  ;;  %v1009_v20 = vmul.f32 %v992_v12, %v1961_v3  ;;  %v1015_v5 = vmul.f32 %v992_v12, %v1956_v63  ;;  %v1005_v21 = vadd.f32 %v1519_v4, %v1004_v14 }
  0xb5   : > { %1504 = vst [vmem:[%s1837_s29 + $0x10] sm:$0xff] %v962_v7  ;;  %v1007_v6 = vmul.f32 %v1502_v18, %v1967_v36  ;;  %954 = vst [vmem:[%s1837_s29] sm:$0xff] %v953_v15  ;;  %v1011_v22 = vmul.f32 %v1000_v17, %v1959_v1  ;;  %v1017_v60 = vmul.f32 %v1000_v17, %v1967_v36 }
  0xb6   : > { %1503 = vst [vmem:[%s1837_s29 + $0x8] sm:$0xff] %v958_v16  ;;  %v984_v8 = vadd.f32 %v983_v13, %v981_v19  ;;  %v1054_v23 = vmul.f32 %v1928_v0, %v1961_v3  ;;  %v1010_v24 = vadd.f32 %v1009_v20, %v976_v55  ;;  %v1056_v26 = vmul.f32 %v1973_v10, %v1959_v1 }
  0xb7   : > { %v1008_v25 = vadd.f32 %v1007_v6, %v1005_v21  ;;  %v1060_v18 = vmul.f32 %v1928_v0, %v1956_v63  ;;  %v1062_v29 = vmul.f32 %v1973_v10, %v1967_v36  ;;  %1108 = sbr.rel (!%p1724_p10) target bundleno = 190 (0xbe), region = 234  ;;  %v1148_v0 = vld [vmem:[%s1868_s25 + $0x8] sm:$0xff] (%p1724_p10)  ;;  %v1150_v63 = vld [vmem:[%s1868_s25 + $0x10] sm:$0xff] (%p1724_p10)  ;;  %v1152_v36 = vld [vmem:[%s1868_s25 + $0x18] sm:$0xff] (%p1724_p10) }
  0xb8   : > { %v1016_v27 = vadd.f32 %v1015_v5, %v984_v8  ;;  %v1055_v28 = vadd.f32 %v1054_v23, %v1971_v9  ;;  %v1012_v30 = vadd.f32 %v1011_v22, %v1010_v24  ;;  %v1154_v9 = vld [vmem:[%s1868_s25 + $0x20] sm:$0xff] (%p1724_p10)  ;;  %1149 = vst [vmem:[%s1110_s19 + $0x10] sm:$0xff] (%p1724_p10), %v1148_v0  ;;  %1151 = vst [vmem:[%s1110_s19 + $0x20] sm:$0xff] (%p1724_p10), %v1150_v63 }
  0xb9   : > { %v1021_v3 = vmul.f32 %v1008_v25, %v1853_v42  ;;  %v1061_v31 = vadd.f32 %v1060_v18, %v1975_v11  ;;  %v1146_v42 = vld [vmem:[%s1868_s25] sm:$0xff] (%p1724_p10)  ;;  %1153 = vst [vmem:[%s1110_s19 + $0x30] sm:$0xff] (%p1724_p10), %v1152_v36  ;;  %1155 = vst [vmem:[%s1110_s19 + $0x40] sm:$0xff] (%p1724_p10), %v1154_v9 }
  0xba   : > { %v1018_v32 = vadd.f32 %v1017_v60, %v1016_v27  ;;  %v1057_v33 = vadd.f32 %v1056_v26, %v1055_v28  ;;  %1522 = vst [vmem:[%s1837_s29 + $0x28] sm:$0xff] %v1012_v30  ;;  %1147 = vst [vmem:[%s1110_s19] sm:$0xff] (%p1724_p10), %v1146_v42 }
  0xbb   : > { %v1022_v34 = vadd.f32 %v1021_v3, %v992_v12  ;;  %v1063_v1 = vadd.f32 %v1062_v29, %v1061_v31 }
  0xbc   : > { %1523 = vst [vmem:[%s1837_s29 + $0x30] sm:$0xff] %v1018_v32  ;;  %1537 = vst [vmem:[%s1837_s29 + $0x50] sm:$0xff] %v1057_v33 }
  0xbd   : > { %1524 = vst [vmem:[%s1837_s29 + $0x38] sm:$0xff] %v1022_v34  ;;  %1538 = vst [vmem:[%s1837_s29 + $0x58] sm:$0xff] %v1063_v1 }
  0xbe PF: > { %1161 = sbr.rel (!%p1724_p10) target bundleno = 205 (0xcd), region = 272  ;;  %s1553_s20 = sshll.u32 (%p1724_p10), %s1705_s0, 3  ;;  %v1239_v10 = vld [vmem:[%s1837_s29] sm:$0xff] (%p1724_p10)  ;;  %v1241_v11 = vld [vmem:[%s1837_s29 + $0x8] sm:$0xff] (%p1724_p10)  ;;  %v1243_v35 = vld [vmem:[%s1837_s29 + $0x10] sm:$0xff] (%p1724_p10) }
  0xbf   : > { %s2062_s22 = scalar_lea.vmem (%p1724_p10), %s2128_s7, %s1553_s20  ;;  %v1245_v37 = vld [vmem:[%s1837_s29 + $0x18] sm:$0xff] (%p1724_p10)  ;;  %v1247_v38 = vld [vmem:[%s1837_s29 + $0x20] sm:$0xff] (%p1724_p10)  ;;  %v1257_v44 = vld [vmem:[%s1837_s29 + $0x48] sm:$0xff] (%p1724_p10) }
  0xc0   : > { %1240 = vst [vmem:[%s2062_s22] sm:$0xff] (%p1724_p10), %v1239_v10  ;;  %1242 = vst [vmem:[%s2062_s22 + $0x10] sm:$0xff] (%p1724_p10), %v1241_v11  ;;  %v1255_v43 = vld [vmem:[%s1837_s29 + $0x40] sm:$0xff] (%p1724_p10)  ;;  %v1265_v48 = vld [vmem:[%s1837_s29 + $0x68] sm:$0xff] (%p1724_p10) }
  0xc1   : > { %v1249_v39 = vld [vmem:[%s1837_s29 + $0x28] sm:$0xff] (%p1724_p10)  ;;  %1244 = vst [vmem:[%s2062_s22 + $0x20] sm:$0xff] (%p1724_p10), %v1243_v35  ;;  %1246 = vst [vmem:[%s2062_s22 + $0x30] sm:$0xff] (%p1724_p10), %v1245_v37  ;;  %v1263_v47 = vld [vmem:[%s1837_s29 + $0x60] sm:$0xff] (%p1724_p10) }
  0xc2   : > { %1248 = vst [vmem:[%s2062_s22 + $0x40] sm:$0xff] (%p1724_p10), %v1247_v38  ;;  %1250 = vst [vmem:[%s2062_s22 + $0x50] sm:$0xff] (%p1724_p10), %v1249_v39  ;;  %v1267_v49 = vld [vmem:[%s1837_s29 + $0x70] sm:$0xff] (%p1724_p10)  ;;  %v1269_v50 = vld [vmem:[%s1837_s29 + $0x78] sm:$0xff] (%p1724_p10) }
  0xc3   : > { %v1251_v40 = vld [vmem:[%s1837_s29 + $0x30] sm:$0xff] (%p1724_p10)  ;;  %1256 = vst [vmem:[%s2062_s22 + $0x80] sm:$0xff] (%p1724_p10), %v1255_v43  ;;  %1258 = vst [vmem:[%s2062_s22 + $0x90] sm:$0xff] (%p1724_p10), %v1257_v44  ;;  %v1271_v51 = vld [vmem:[%s1837_s29 + $0x80] sm:$0xff] (%p1724_p10) }
  0xc4   : > { %v1253_v41 = vld [vmem:[%s1837_s29 + $0x38] sm:$0xff] (%p1724_p10)  ;;  %1252 = vst [vmem:[%s2062_s22 + $0x60] sm:$0xff] (%p1724_p10), %v1251_v40  ;;  %v1259_v45 = vld [vmem:[%s1837_s29 + $0x50] sm:$0xff] (%p1724_p10)  ;;  %1264 = vst [vmem:[%s2062_s22 + $0xc0] sm:$0xff] (%p1724_p10), %v1263_v47 }
  0xc5   : > { %1254 = vst [vmem:[%s2062_s22 + $0x70] sm:$0xff] %v1253_v41  ;;  %v1261_v46 = vld [vmem:[%s1837_s29 + $0x58] sm:$0xff]  ;;  %1260 = vst [vmem:[%s2062_s22 + $0xa0] sm:$0xff] %v1259_v45  ;;  %v1273_v52 = vld [vmem:[%s1837_s29 + $0x88] sm:$0xff] }
  0xc6   : > { %1262 = vst [vmem:[%s2062_s22 + $0xb0] sm:$0xff] %v1261_v46  ;;  %1266 = vst [vmem:[%s2062_s22 + $0xd0] sm:$0xff] %v1265_v48  ;;  %v1275_v53 = vld [vmem:[%s1837_s29 + $0x90] sm:$0xff]  ;;  %v1277_v54 = vld [vmem:[%s1837_s29 + $0x98] sm:$0xff] }
  0xc7   : > { %1268 = vst [vmem:[%s2062_s22 + $0xe0] sm:$0xff] %v1267_v49  ;;  %1270 = vst [vmem:[%s2062_s22 + $0xf0] sm:$0xff] %v1269_v50  ;;  %v1279_v55 = vld [vmem:[%s1837_s29 + $0xa0] sm:$0xff]  ;;  %v1281_v56 = vld [vmem:[%s1837_s29 + $0xa8] sm:$0xff] }
  0xc8   : > { %1272 = vst [vmem:[%s2062_s22 + $0x100] sm:$0xff] %v1271_v51  ;;  %1274 = vst [vmem:[%s2062_s22 + $0x110] sm:$0xff] %v1273_v52  ;;  %v1283_v57 = vld [vmem:[%s1837_s29 + $0xb0] sm:$0xff]  ;;  %v1285_v58 = vld [vmem:[%s1837_s29 + $0xb8] sm:$0xff] }
  0xc9   : > { %1276 = vst [vmem:[%s2062_s22 + $0x120] sm:$0xff] %v1275_v53  ;;  %1278 = vst [vmem:[%s2062_s22 + $0x130] sm:$0xff] %v1277_v54  ;;  %v1287_v59 = vld [vmem:[%s1837_s29 + $0xc0] sm:$0xff] }
  0xca   : > { %1280 = vst [vmem:[%s2062_s22 + $0x140] sm:$0xff] %v1279_v55  ;;  %1282 = vst [vmem:[%s2062_s22 + $0x150] sm:$0xff] %v1281_v56 }
  0xcb   : > { %1284 = vst [vmem:[%s2062_s22 + $0x160] sm:$0xff] %v1283_v57  ;;  %1286 = vst [vmem:[%s2062_s22 + $0x170] sm:$0xff] %v1285_v58 }
  0xcc   : > { %1288 = vst [vmem:[%s2062_s22 + $0x180] sm:$0xff] %v1287_v59 }
  0xcd PF: > { %p21_p1 = scmp.ge.s32.totalorder %s1708_s9, 4   ;;  %s2131_s29 = smov %s1632_s30 }
  0xce   : > { %s2132_s30 = smov %s1718_s12  ;;  %s2133_s8 = smov %s1708_s9 }
  0xcf   :  { %23 = sbr.rel (!%p21_p1) target bundleno = 17 (0x11), region = 444 }

</bundles_post_ra>
